<compile_context>
chip_gen: v6e
topology: v6e:2x2x1
jax: 0.10.0
libtpu: 0.0.40
codegen_flags: <defaults>
</compile_context>

<pallas_src>
import functools

import jax
import jax.numpy as jnp
from jax import lax
from jax.experimental import pallas as pl
from jax.experimental.pallas import tpu as pltpu


# ----------------------------------------------------------------------------
# VMEM budget / chunk-size helpers
# ----------------------------------------------------------------------------
def _vmem_limit_bytes():
    """Generation-aware scoped-VMEM limit (leaves headroom below physical)."""
    try:
        cap = int(pltpu.get_tpu_info().vmem_capacity_bytes)
    except Exception:
        cap = 128 << 20
    return max(32 << 20, min(cap - (16 << 20), 100 << 20))


def _pick_time_chunk(T, B, D, H, x_bytes, out_bytes, w_bytes, vmem_limit):
    """Largest divisor of T whose double-buffered working set fits the budget."""
    budget = int(0.6 * vmem_limit)
    fixed = 2 * (D * 4 * H + H * 4 * H + 4 * H) * w_bytes + 2 * B * H * 4
    per_t = B * (2 * D * x_bytes + 2 * H * out_bytes + 4 * H * 4)
    best = 1
    for tc in range(1, T + 1):
        if T % tc == 0 and fixed + tc * per_t <= budget:
            best = tc
    return best


def _round_up(n, m):
    return ((n + m - 1) // m) * m


# ----------------------------------------------------------------------------
# Kernel 1: fused bidirectional, time-chunked, length-masked LSTM (time-major)
# ----------------------------------------------------------------------------
def _bilstm_kernel(lens_ref, x_ref, wih_ref, whh_ref, bias_ref, out_ref,
                   h_scr, c_scr, xp_scr, *, compute_dtype):
    d = pl.program_id(0)            # direction: 0 = forward, 1 = backward
    ci = pl.program_id(1)           # time-chunk index, in recurrence order
    n_chunks = pl.num_programs(1)

    TC, B, D = x_ref.shape          # block dims (static python ints)
    H = h_scr.shape[-1]

    @pl.when(ci == 0)
    def _():
        h_scr[...] = jnp.zeros_like(h_scr)
        c_scr[...] = jnp.zeros_like(c_scr)

    # Chunk-level input projection on the MXU: (TC*B, D) @ (D, 4H).
    # Operands are already host-cast to compute_dtype; astype is a no-op then.
    x2 = x_ref[...].reshape(TC * B, D).astype(compute_dtype)
    w_ih = wih_ref[...].astype(compute_dtype)               # (D, 4H)
    xp = jnp.dot(x2, w_ih, preferred_element_type=jnp.float32)
    xp_scr[...] = xp.reshape(TC, B, 4 * H) + bias_ref[...]  # + (b_ih + b_hh)

    w_hh = whh_ref[...].astype(compute_dtype)                # (H, 4H)
    lens = lens_ref[...]                                     # (B, 1) int32
    is_bwd = d == 1
    # original-time index of the first token of this chunk
    t0 = jnp.where(is_bwd, n_chunks - 1 - ci, ci) * TC

    def sigm(v):
        # sigmoid via tanh: single EUP push (vs exp + recip), VALU does the rest
        return 0.5 * jnp.tanh(0.5 * v) + 0.5

    def step(s, carry):
        h, cell = carry
        # within-chunk position in *original* time order
        # forward: s ; backward: TC - 1 - s (recurrence runs back-to-front)
        local = jnp.where(is_bwd, TC - 1 - s, s)
        t_orig = t0 + local

        xg = xp_scr[local]                                    # (B, 4H) full tile
        gates = xg + jnp.dot(h.astype(compute_dtype), w_hh,
                             preferred_element_type=jnp.float32)
        # PyTorch gate order: i, f, g, o (lane-aligned when H % 128 == 0;
        # production H=128 hits the aligned path).
        i = sigm(gates[:, 0 * H:1 * H])
        f = sigm(gates[:, 1 * H:2 * H])
        g = jnp.tanh(gates[:, 2 * H:3 * H])
        o = sigm(gates[:, 3 * H:4 * H])

        c_new = f * cell + i * g
        h_new = o * jnp.tanh(c_new)

        # validity mask: 1.0 while t_orig < len[b], else 0.0
        m = (t_orig < lens).astype(jnp.float32)               # (B, 1)
        h_new = h_new * m
        c_new = c_new * m

        out_ref[local] = h_new.astype(out_ref.dtype)          # (B, H) full tile
        return (h_new, c_new)

    unroll = True if TC <= 32 else 8
    h_fin, c_fin = lax.fori_loop(0, TC, step, (h_scr[...], c_scr[...]),
                                 unroll=unroll)
    h_scr[...] = h_fin
    c_scr[...] = c_fin


def bilstm_call(x_tbd, lens, wih, whh, bias, B, T, H, TC, *,
                compute_dtype, out_dtype, vmem_limit, core_parallel=False):
    D = x_tbd.shape[-1]
    n_chunks = T // TC

    def time_block(d, ci):
        # forward: chunk ci ; backward: chunk n_chunks - 1 - ci
        return ci + d * (n_chunks - 1 - 2 * ci)

    # On v7x (2 TCs/chip) the two independent directions can be mapped onto
    # the two TensorCores; plain "parallel" keeps single-core codegen.
    dir_sem = pltpu.CORE_PARALLEL if core_parallel else "parallel"

    return pl.pallas_call(
        functools.partial(_bilstm_kernel, compute_dtype=compute_dtype),
        out_shape=jax.ShapeDtypeStruct((2, T, B, H), out_dtype),
        grid=(2, n_chunks),
        in_specs=[
            pl.BlockSpec((B, 1), lambda d, ci: (0, 0)),                       # lens
            pl.BlockSpec((TC, B, D),
                         lambda d, ci: (time_block(d, ci), 0, 0)),            # x (T-major)
            pl.BlockSpec((None, D, 4 * H), lambda d, ci: (d, 0, 0)),          # W_ih^T
            pl.BlockSpec((None, H, 4 * H), lambda d, ci: (d, 0, 0)),          # W_hh^T
            pl.BlockSpec((None, 1, 4 * H), lambda d, ci: (d, 0, 0)),          # bias
        ],
        out_specs=pl.BlockSpec((None, TC, B, H),
                               lambda d, ci: (d, time_block(d, ci), 0, 0)),
        scratch_shapes=[
            pltpu.VMEM((B, H), jnp.float32),           # h state
            pltpu.VMEM((B, H), jnp.float32),           # c state
            pltpu.VMEM((TC, B, 4 * H), jnp.float32),   # chunk input projection
        ],
        compiler_params=pltpu.CompilerParams(
            dimension_semantics=(dir_sem, "arbitrary"),
            vmem_limit_bytes=int(vmem_limit)),
    )(lens, x_tbd, wih, whh, bias)


# ----------------------------------------------------------------------------
# Kernel 2: tiled head: kmax(k=2) over combined hidden per T-chunk ->
#           fc1 partial accumulation over T -> BatchNorm1d (training stats) ->
#           ReLU -> fc2 (padded to 128 lanes) on the last chunk
# ----------------------------------------------------------------------------
def _head_kernel(x_ref, w1a_ref, w1b_ref, b1_ref, g_ref, beta_ref,
                 w2_ref, b2_ref, o_ref, acc_ref):
    ci = pl.program_id(0)

    xf = x_ref[0].astype(jnp.float32)   # (TCh, B, H) forward hidden ([0, H))
    xb = x_ref[1].astype(jnp.float32)   # (TCh, B, H) backward hidden ([H, 2H))
    TCh, B, H = xf.shape
    big = jnp.int32(2 ** 30)
    iota_f = lax.broadcasted_iota(jnp.int32, (1, 1, H), 2)   # lane-only iota
    iota_b = iota_f + H

    # top-1 value over the combined 2H axis + its lowest combined index
    m1 = jnp.maximum(jnp.max(xf, axis=-1, keepdims=True),
                     jnp.max(xb, axis=-1, keepdims=True))
    i1 = jnp.minimum(
        jnp.min(jnp.where(xf == m1, iota_f, big), axis=-1, keepdims=True),
        jnp.min(jnp.where(xb == m1, iota_b, big), axis=-1, keepdims=True))

    # mask out the top-1 position, take the second max
    xf2 = jnp.where(iota_f == i1, -jnp.inf, xf)
    xb2 = jnp.where(iota_b == i1, -jnp.inf, xb)
    m2 = jnp.maximum(jnp.max(xf2, axis=-1, keepdims=True),
                     jnp.max(xb2, axis=-1, keepdims=True))
    i2 = jnp.minimum(
        jnp.min(jnp.where(xf2 == m2, iota_f, big), axis=-1, keepdims=True),
        jnp.min(jnp.where(xb2 == m2, iota_b, big), axis=-1, keepdims=True))

    # keep the two values in original hidden-index order (torch kmax_pooling)
    first = jnp.where(i1 < i2, m1, m2)[..., 0]    # (TCh, B)  -> k = 0
    second = jnp.where(i1 < i2, m2, m1)[..., 0]   # (TCh, B)  -> k = 1

    @pl.when(ci == 0)
    def _():
        acc_ref[...] = jnp.zeros_like(acc_ref)

    # fc1 partial for this time chunk (flat feature index = k*T + t):
    # contract the TCh axis of the (TCh, B) features with the (TCh, LHp)
    # weight slabs -> (B, LHp) partial.
    nt = (((0,), (0,)), ((), ()))
    acc_ref[...] += (
        lax.dot_general(first, w1a_ref[...], nt,
                        preferred_element_type=jnp.float32)
        + lax.dot_general(second, w1b_ref[...], nt,
                          preferred_element_type=jnp.float32))

    @pl.when(ci == pl.num_programs(0) - 1)
    def _():
        h = acc_ref[...] + b1_ref[...]
        # fc[1] BatchNorm1d (training batch stats, biased variance) over B
        mean = jnp.mean(h, axis=0, keepdims=True)
        var = jnp.mean((h - mean) ** 2, axis=0, keepdims=True)
        hn = (h - mean) * lax.rsqrt(var + 1e-5) * g_ref[...] + beta_ref[...]
        # fc[2] ReLU -> fc[3] Linear
        hr = jnp.maximum(hn, 0.0)
        o_ref[...] = (jnp.dot(hr, w2_ref[...], preferred_element_type=jnp.float32)
                      + b2_ref[...]).astype(o_ref.dtype)


def head_call(lstm_out, params, B, T, *, time_chunk=None, vmem_limit):
    H = lstm_out.shape[-1]
    LH = params["fc1_b"].shape[0]          # linear_hidden
    NC = params["fc2_b"].shape[0]          # num_classes
    LHp = _round_up(LH, 128)
    NCp = _round_up(NC, 128)

    # zero-pad the tiny head weights to 128-lane widths (padded columns stay
    # exactly zero through Linear/BN/ReLU/Linear, so real outputs are unchanged)
    w1t = params["fc1_w"].T                                      # (2T, LH)
    w1a = jnp.pad(w1t[:T], ((0, 0), (0, LHp - LH)))              # k=0 slab (T, LHp)
    w1b = jnp.pad(w1t[T:], ((0, 0), (0, LHp - LH)))              # k=1 slab (T, LHp)
    b1 = jnp.pad(params["fc1_b"], (0, LHp - LH)).reshape(1, LHp)
    g = jnp.pad(params["bn_gamma"], (0, LHp - LH)).reshape(1, LHp)
    be = jnp.pad(params["bn_beta"], (0, LHp - LH)).reshape(1, LHp)
    w2 = jnp.pad(params["fc2_w"].T, ((0, LHp - LH), (0, NCp - NC)))   # (LHp, NCp)
    b2 = jnp.pad(params["fc2_b"], (0, NCp - NC)).reshape(1, NCp)

    if time_chunk is not None and T % time_chunk == 0:
        TCh = time_chunk
    else:
        TCh = next((c for c in (512, 256, 128, 64, 32, 16, 8) if T % c == 0), T)
    n_chunks = T // TCh

    out = pl.pallas_call(
        _head_kernel,
        out_shape=jax.ShapeDtypeStruct((B, NCp), jnp.float32),
        grid=(n_chunks,),
        in_specs=[
            pl.BlockSpec((2, TCh, B, H), lambda ci: (0, ci, 0, 0)),   # lstm_out
            pl.BlockSpec((TCh, LHp), lambda ci: (ci, 0)),             # W1 (k=0)
            pl.BlockSpec((TCh, LHp), lambda ci: (ci, 0)),             # W1 (k=1)
            pl.BlockSpec((1, LHp), lambda ci: (0, 0)),                # b1
            pl.BlockSpec((1, LHp), lambda ci: (0, 0)),                # gamma
            pl.BlockSpec((1, LHp), lambda ci: (0, 0)),                # beta
            pl.BlockSpec((LHp, NCp), lambda ci: (0, 0)),              # W2
            pl.BlockSpec((1, NCp), lambda ci: (0, 0)),                # b2
        ],
        out_specs=pl.BlockSpec((B, NCp), lambda ci: (0, 0)),
        scratch_shapes=[pltpu.VMEM((B, LHp), jnp.float32)],           # fc1 acc
        compiler_params=pltpu.CompilerParams(
            dimension_semantics=("arbitrary",),
            vmem_limit_bytes=int(vmem_limit)),
    )(lstm_out, w1a, w1b, b1, g, be, w2, b2)
    return out[:, :NC]


# ----------------------------------------------------------------------------
# Full forward (Pallas path)
# ----------------------------------------------------------------------------
def _prepare_lstm_inputs(params, word_inputs, word_seq_lengths, matmul_dtype):
    B, T, _ = word_inputs.shape
    # TODO(synk): embedding gather has no clean Pallas equivalent; done as
    # plain-JAX glue (jnp.take) feeding the fused LSTM kernel.
    wi = jnp.swapaxes(word_inputs, 0, 1)                      # (T, B, 2) time-major
    emb_w = jnp.take(params["emb_word"], wi[:, :, 0], axis=0)
    emb_p = jnp.take(params["emb_pos"], wi[:, :, 1], axis=0)
    x = jnp.concatenate([emb_w, emb_p], axis=-1).astype(matmul_dtype)  # (T, B, D)

    # stacked per-direction weights, transposed for right-multiplication;
    # streaming operands host-cast to the MXU dtype (no per-step in-kernel cast)
    wih = jnp.stack([params["w_ih"][0].T, params["w_ih"][1].T]).astype(matmul_dtype)
    whh = jnp.stack([params["w_hh"][0].T, params["w_hh"][1].T]).astype(matmul_dtype)
    bias = jnp.stack([
        (params["b_ih"][0] + params["b_hh"][0]).reshape(1, -1),
        (params["b_ih"][1] + params["b_hh"][1]).reshape(1, -1),
    ]).astype(jnp.float32)                                     # (2, 1, 4H)
    lens = word_seq_lengths.astype(jnp.int32).reshape(B, 1)
    return x, wih, whh, bias, lens


def lstm_text_mix_forward(params, word_inputs, word_seq_lengths, mask_unused=None,
                          *, time_chunk=None, head_time_chunk=None,
                          matmul_dtype=jnp.float32, lstm_out_dtype=jnp.float32,
                          direction_core_parallel=False):
    # word_inputs: (B, T, 2) int32; word_seq_lengths: (B,) int32 (sorted desc)
    B, T, _ = word_inputs.shape
    H = params["lstm_hidden"]

    x, wih, whh, bias, lens = _prepare_lstm_inputs(
        params, word_inputs, word_seq_lengths, matmul_dtype)
    D = x.shape[-1]

    vmem_limit = _vmem_limit_bytes()
    if time_chunk is not None and T % time_chunk == 0:
        TC = time_chunk
    else:
        TC = _pick_time_chunk(T, B, D, H, x.dtype.itemsize,
                              jnp.dtype(lstm_out_dtype).itemsize,
                              wih.dtype.itemsize, vmem_limit)

    lstm_out = bilstm_call(x, lens, wih, whh, bias, B, T, H, TC,
                           compute_dtype=matmul_dtype, out_dtype=lstm_out_dtype,
                           vmem_limit=vmem_limit,
                           core_parallel=direction_core_parallel)

    return head_call(lstm_out, params, B, T,
                     time_chunk=head_time_chunk, vmem_limit=vmem_limit)


# ----------------------------------------------------------------------------
# Pure-JAX reference (mirrors the PyTorch semantics) for validation
# ----------------------------------------------------------------------------
def reference_forward(params, word_inputs, word_seq_lengths):
    B, T, _ = word_inputs.shape
    H = params["lstm_hidden"]
    emb_w = jnp.take(params["emb_word"], word_inputs[:, :, 0], axis=0)
    emb_p = jnp.take(params["emb_pos"], word_inputs[:, :, 1], axis=0)
    x = jnp.concatenate([emb_w, emb_p], axis=-1).astype(jnp.float32)  # (B, T, D)
    mask_bt = (jnp.arange(T)[None, :] < word_seq_lengths[:, None]).astype(jnp.float32)

    def run_dir(xd, md, wih, whh, bih, bhh):
        def step(carry, inp):
            h, c = carry
            xt, mt = inp
            gates = xt @ wih.T + bih + h @ whh.T + bhh
            i, f, g, o = jnp.split(gates, 4, axis=-1)
            i = jax.nn.sigmoid(i); f = jax.nn.sigmoid(f)
            g = jnp.tanh(g); o = jax.nn.sigmoid(o)
            c_new = f * c + i * g
            h_new = o * jnp.tanh(c_new)
            m = mt[:, None]
            return (h_new * m, c_new * m), h_new * m

        init = (jnp.zeros((B, H), jnp.float32), jnp.zeros((B, H), jnp.float32))
        _, hs = jax.lax.scan(
            step, init, (jnp.swapaxes(xd, 0, 1), jnp.swapaxes(md, 0, 1)))
        return hs  # (T, B, H)

    h_fwd = run_dir(x, mask_bt, params["w_ih"][0], params["w_hh"][0],
                    params["b_ih"][0], params["b_hh"][0])
    h_bwd = jnp.flip(
        run_dir(jnp.flip(x, axis=1), jnp.flip(mask_bt, axis=1),
                params["w_ih"][1], params["w_hh"][1],
                params["b_ih"][1], params["b_hh"][1]),
        axis=0,
    )
    lstm_out = jnp.concatenate([h_fwd, h_bwd], axis=-1)   # (T, B, 2H)
    lstm_bht = jnp.transpose(lstm_out, (1, 2, 0))         # (B, 2H, T)  (torch permute)

    # kmax_pooling(x, dim=1, k=2)
    xk = jnp.moveaxis(lstm_bht, 1, -1)                    # (B, T, 2H)
    _, idx = jax.lax.top_k(xk, 2)
    idx_sorted = jnp.sort(idx, axis=-1)
    gathered = jnp.take_along_axis(xk, idx_sorted, axis=-1)  # (B, T, 2)
    conv_out = jnp.moveaxis(gathered, -1, 1)              # (B, 2, T)
    reshaped = conv_out.reshape(B, -1)                    # (B, 2T)

    h = reshaped @ params["fc1_w"].T + params["fc1_b"]
    mean = jnp.mean(h, axis=0, keepdims=True)
    var = jnp.mean((h - mean) ** 2, axis=0, keepdims=True)
    hn = (h - mean) / jnp.sqrt(var + 1e-5) * params["bn_gamma"] + params["bn_beta"]
    hr = jnp.maximum(hn, 0.0)
    return hr @ params["fc2_w"].T + params["fc2_b"]


# ----------------------------------------------------------------------------
# Deterministic parameter construction + demo
# ----------------------------------------------------------------------------
def make_params(key, vocab_word, vocab_pos, emb_word, emb_pos,
                lstm_hidden, input_len, linear_hidden, num_classes, kmax=2):
    keys = jax.random.split(key, 20)
    D = emb_word + emb_pos
    H = lstm_hidden

    def n(k, shape, scale=0.1):
        return (scale * jax.random.normal(k, shape)).astype(jnp.float32)

    params = {
        "emb_word": n(keys[0], (vocab_word, emb_word), 0.5),
        "emb_pos": n(keys[1], (vocab_pos, emb_pos), 0.5),
        # per-direction LSTM weights (PyTorch shapes), dir 0 = fwd, 1 = bwd
        "w_ih": [n(keys[2], (4 * H, D)), n(keys[3], (4 * H, D))],
        "w_hh": [n(keys[4], (4 * H, H)), n(keys[5], (4 * H, H))],
        "b_ih": [n(keys[6], (4 * H,)), n(keys[7], (4 * H,))],
        "b_hh": [n(keys[8], (4 * H,)), n(keys[9], (4 * H,))],
        # fc = Linear(kmax*input_len, linear_hidden) -> BN -> ReLU -> Linear
        "fc1_w": n(keys[10], (linear_hidden, kmax * input_len)),
        "fc1_b": n(keys[11], (linear_hidden,)),
        "bn_gamma": (1.0 + 0.1 * jax.random.normal(keys[12], (linear_hidden,))
                     ).astype(jnp.float32),
        "bn_beta": n(keys[13], (linear_hidden,)),
        "fc2_w": n(keys[14], (num_classes, linear_hidden)),
        "fc2_b": n(keys[15], (num_classes,)),
        "lstm_hidden": H,
        "num_classes": num_classes,
    }
    return params


if __name__ == "__main__":
    # Small config consistent with the module: bilstm, 1 LSTM layer, kmax=2.
    B, T = 2, 16                 # T == feature_length (input_len)
    vocab_word, vocab_pos = 50, 12
    emb_word, emb_pos = 16, 8    # input_size = 24
    hidden_dim = 32              # bidirectional -> lstm_hidden = 16 per direction
    lstm_hidden = hidden_dim // 2
    linear_hidden, num_classes = 10, 2

    key = jax.random.PRNGKey(0)
    k_param, k_w, k_p = jax.random.split(key, 3)
    params = make_params(k_param, vocab_word, vocab_pos, emb_word, emb_pos,
                         lstm_hidden, T, linear_hidden, num_classes)

    word_ids = jax.random.randint(k_w, (B, T), 0, vocab_word, dtype=jnp.int32)
    pos_ids = jax.random.randint(k_p, (B, T), 0, vocab_pos, dtype=jnp.int32)
    word_inputs = jnp.stack([word_ids, pos_ids], axis=-1)          # (B, T, 2)
    word_seq_lengths = jnp.array([T, 12], dtype=jnp.int32)         # sorted descending
    mask = (jnp.arange(T)[None, :] < word_seq_lengths[:, None])    # unused by forward

    # ---- f32 path: validated against the pure-JAX reference -----------------
    logits = lstm_text_mix_forward(params, word_inputs, word_seq_lengths, mask,
                                   time_chunk=8, head_time_chunk=8)
    logits = jax.block_until_ready(logits)
    ref = jax.block_until_ready(
        reference_forward(params, word_inputs, word_seq_lengths))
    assert logits.shape == (B, num_classes)
    assert jnp.allclose(logits, ref, atol=1e-3, rtol=1e-3), (logits, ref)

    # ---- bf16-streaming path: validate the LSTM hidden states vs f32 --------
    vmem_limit = _vmem_limit_bytes()
    x32, wih32, whh32, bias32, lens = _prepare_lstm_inputs(
        params, word_inputs, word_seq_lengths, jnp.float32)
    lstm_f32 = bilstm_call(x32, lens, wih32, whh32, bias32, B, T, lstm_hidden, 8,
                           compute_dtype=jnp.float32, out_dtype=jnp.float32,
                           vmem_limit=vmem_limit)
    x16, wih16, whh16, bias16, _ = _prepare_lstm_inputs(
        params, word_inputs, word_seq_lengths, jnp.bfloat16)
    lstm_bf16 = bilstm_call(x16, lens, wih16, whh16, bias16, B, T, lstm_hidden, 8,
                            compute_dtype=jnp.bfloat16, out_dtype=jnp.bfloat16,
                            vmem_limit=vmem_limit)
    lstm_f32, lstm_bf16 = jax.block_until_ready((lstm_f32, lstm_bf16))
    max_diff = float(jnp.max(jnp.abs(lstm_bf16.astype(jnp.float32) - lstm_f32)))
    assert max_diff < 5e-2, max_diff
    # NOTE: bf16 rounding compounds over T; re-validate tolerance at production
    # sequence lengths before shipping matmul_dtype=bfloat16.

    # full bf16 forward (bf16 x / weights / lstm_out): compile + run smoke test
    logits_bf16 = jax.block_until_ready(
        lstm_text_mix_forward(params, word_inputs, word_seq_lengths, mask,
                              time_chunk=8, head_time_chunk=8,
                              matmul_dtype=jnp.bfloat16,
                              lstm_out_dtype=jnp.bfloat16))
    assert logits_bf16.shape == (B, num_classes)
    assert bool(jnp.all(jnp.isfinite(logits_bf16)))

    print("KERNEL_OK")
</pallas_src>

<mosaic_0001>
module attributes {stable_mosaic.version = 11 : i64} {
  func.func @_bilstm_kernel(%arg0: i32, %arg1: i32, %arg2: memref<2x1xi32, #tpu.memory_space<vmem>>, %arg3: memref<8x2x24xf32, #tpu.memory_space<vmem>>, %arg4: memref<1x24x64xf32, #tpu.memory_space<vmem>>, %arg5: memref<1x16x64xf32, #tpu.memory_space<vmem>>, %arg6: memref<1x1x64xf32, #tpu.memory_space<vmem>>, %arg7: memref<1x8x2x16xf32, #tpu.memory_space<vmem>>, %arg8: memref<2x16xf32, #tpu.memory_space<vmem>>, %arg9: memref<2x16xf32, #tpu.memory_space<vmem>>, %arg10: memref<8x2x64xf32, #tpu.memory_space<vmem>>) attributes {dimension_semantics = [#tpu.dimension_semantics<parallel>, #tpu.dimension_semantics<arbitrary>], iteration_bounds = array<i64: 2, 2>, scalar_prefetch = 0 : i64, scratch_operands = 3 : i64, tpu.core_type = #tpu.core_type<tc>, window_params = [{pipeline_mode = #tpu.pipeline_mode<synchronous>, transform_indices = @transform_0, window_bounds = array<i64: 2, 1>}, {transform_indices = @transform_1, window_bounds = array<i64: 8, 2, 24>}, {transform_indices = @transform_2, window_bounds = array<i64: 1, 24, 64>}, {transform_indices = @transform_3, window_bounds = array<i64: 1, 16, 64>}, {transform_indices = @transform_4, window_bounds = array<i64: 1, 1, 64>}, {transform_indices = @transform_5, window_bounds = array<i64: 1, 8, 2, 16>}]} {
    %c0_i32 = arith.constant 0 : i32
    %0 = arith.cmpi eq, %arg1, %c0_i32 : i32
    %1 = arith.extui %0 : i1 to i32
    %c0_i32_0 = arith.constant 0 : i32
    %2 = arith.cmpi ne, %1, %c0_i32_0 : i32
    scf.if %2 {
      %cst_157 = arith.constant 0.000000e+00 : f32
      %434 = vector.broadcast %cst_157 : f32 to vector<2x16xf32>
      %c0_158 = arith.constant 0 : index
      %c0_159 = arith.constant 0 : index
      %435 = vector.load %arg8[%c0_158, %c0_159] : memref<2x16xf32, #tpu.memory_space<vmem>>, vector<2x16xf32>
      tpu.vector_store %arg8[%c0_158, %c0_159], %434 {strides = array<i32>} : memref<2x16xf32, #tpu.memory_space<vmem>>, vector<2x16xf32>,
      %cst_160 = arith.constant 0.000000e+00 : f32
      %436 = vector.broadcast %cst_160 : f32 to vector<2x16xf32>
      %c0_161 = arith.constant 0 : index
      %c0_162 = arith.constant 0 : index
      %437 = vector.load %arg9[%c0_161, %c0_162] : memref<2x16xf32, #tpu.memory_space<vmem>>, vector<2x16xf32>
      tpu.vector_store %arg9[%c0_161, %c0_162], %436 {strides = array<i32>} : memref<2x16xf32, #tpu.memory_space<vmem>>, vector<2x16xf32>,
    } else {
    }
    %c0 = arith.constant 0 : index
    %c0_1 = arith.constant 0 : index
    %c0_2 = arith.constant 0 : index
    %3 = vector.load %arg3[%c0, %c0_1, %c0_2] : memref<8x2x24xf32, #tpu.memory_space<vmem>>, vector<8x2x24xf32>
    %4 = vector.shape_cast %3 : vector<8x2x24xf32> to vector<16x24xf32>
    %c0_3 = arith.constant 0 : index
    %c0_4 = arith.constant 0 : index
    %c0_5 = arith.constant 0 : index
    %5 = vector.load %arg4[%c0_3, %c0_4, %c0_5] : memref<1x24x64xf32, #tpu.memory_space<vmem>>, vector<1x24x64xf32>
    %6 = vector.shape_cast %5 : vector<1x24x64xf32> to vector<24x64xf32>
    %cst = arith.constant dense<0.000000e+00> : vector<16x64xf32>
    %7 = tpu.matmul %4, %6, %cst {dimension_numbers = #tpu.dot_dimension_numbers<[1], [0], [0], [1], [0, 0, 1, 1], [], []>} : vector<16x24xf32>, vector<24x64xf32>, vector<16x64xf32> -> vector<16x64xf32>
    %8 = vector.shape_cast %7 : vector<16x64xf32> to vector<8x2x64xf32>
    %c0_6 = arith.constant 0 : index
    %c0_7 = arith.constant 0 : index
    %c0_8 = arith.constant 0 : index
    %9 = vector.load %arg6[%c0_6, %c0_7, %c0_8] : memref<1x1x64xf32, #tpu.memory_space<vmem>>, vector<1x1x64xf32>
    %10 = vector.shape_cast %9 : vector<1x1x64xf32> to vector<1x64xf32>
    %11 = vector.shape_cast %10 : vector<1x64xf32> to vector<1x1x64xf32>
    %12 = vector.broadcast %11 : vector<1x1x64xf32> to vector<8x2x64xf32>
    %13 = arith.addf %8, %12 : vector<8x2x64xf32>
    %c0_9 = arith.constant 0 : index
    %c0_10 = arith.constant 0 : index
    %c0_11 = arith.constant 0 : index
    %14 = vector.load %arg10[%c0_9, %c0_10, %c0_11] : memref<8x2x64xf32, #tpu.memory_space<vmem>>, vector<8x2x64xf32>
    tpu.vector_store %arg10[%c0_9, %c0_10, %c0_11], %13 {strides = array<i32>} : memref<8x2x64xf32, #tpu.memory_space<vmem>>, vector<8x2x64xf32>,
    %c0_12 = arith.constant 0 : index
    %c0_13 = arith.constant 0 : index
    %c0_14 = arith.constant 0 : index
    %15 = vector.load %arg5[%c0_12, %c0_13, %c0_14] : memref<1x16x64xf32, #tpu.memory_space<vmem>>, vector<1x16x64xf32>
    %16 = vector.shape_cast %15 : vector<1x16x64xf32> to vector<16x64xf32>
    %c0_15 = arith.constant 0 : index
    %c0_16 = arith.constant 0 : index
    %17 = vector.load %arg2[%c0_15, %c0_16] : memref<2x1xi32, #tpu.memory_space<vmem>>, vector<2x1xi32>
    %c1_i32 = arith.constant 1 : i32
    %18 = arith.cmpi eq, %arg0, %c1_i32 : i32
    %c1_i32_17 = arith.constant 1 : i32
    %19 = arith.subi %c1_i32_17, %arg1 : i32
    %20 = arith.select %18, %19, %arg1 : i32
    %c8_i32 = arith.constant 8 : i32
    %21 = arith.muli %20, %c8_i32 : i32
    %c0_18 = arith.constant 0 : index
    %c0_19 = arith.constant 0 : index
    %22 = vector.load %arg8[%c0_18, %c0_19] : memref<2x16xf32, #tpu.memory_space<vmem>>, vector<2x16xf32>
    %c0_20 = arith.constant 0 : index
    %c0_21 = arith.constant 0 : index
    %23 = vector.load %arg9[%c0_20, %c0_21] : memref<2x16xf32, #tpu.memory_space<vmem>>, vector<2x16xf32>
    %c0_i32_22 = arith.constant 0 : i32
    %c7_i32 = arith.constant 7 : i32
    %24 = arith.subi %c7_i32, %c0_i32_22 : i32
    %25 = arith.select %18, %24, %c0_i32_22 : i32
    %26 = arith.addi %21, %25 : i32
    %27 = arith.index_cast %25 : i32 to index
    %c0_23 = arith.constant 0 : index
    %c0_24 = arith.constant 0 : index
    %28 = vector.load %arg10[%27, %c0_23, %c0_24] : memref<8x2x64xf32, #tpu.memory_space<vmem>>, vector<1x2x64xf32>
    %29 = vector.shape_cast %28 : vector<1x2x64xf32> to vector<2x64xf32>
    %cst_25 = arith.constant dense<0.000000e+00> : vector<2x64xf32>
    %30 = tpu.matmul %22, %16, %cst_25 {dimension_numbers = #tpu.dot_dimension_numbers<[1], [0], [0], [1], [0, 0, 1, 1], [], []>} : vector<2x16xf32>, vector<16x64xf32>, vector<2x64xf32> -> vector<2x64xf32>
    %31 = arith.addf %29, %30 : vector<2x64xf32>
    %32 = vector.extract_strided_slice %31 {offsets = [0, 0], sizes = [2, 16], strides = [1, 1]} : vector<2x64xf32> to vector<2x16xf32>
    %cst_26 = arith.constant 5.000000e-01 : f32
    %33 = vector.broadcast %cst_26 : f32 to vector<2x16xf32>
    %34 = arith.mulf %33, %32 : vector<2x16xf32>
    %35 = math.tanh %34 : vector<2x16xf32>
    %cst_27 = arith.constant 5.000000e-01 : f32
    %36 = vector.broadcast %cst_27 : f32 to vector<2x16xf32>
    %37 = arith.mulf %36, %35 : vector<2x16xf32>
    %cst_28 = arith.constant 5.000000e-01 : f32
    %38 = vector.broadcast %cst_28 : f32 to vector<2x16xf32>
    %39 = arith.addf %37, %38 : vector<2x16xf32>
    %40 = vector.extract_strided_slice %31 {offsets = [0, 16], sizes = [2, 16], strides = [1, 1]} : vector<2x64xf32> to vector<2x16xf32>
    %cst_29 = arith.constant 5.000000e-01 : f32
    %41 = vector.broadcast %cst_29 : f32 to vector<2x16xf32>
    %42 = arith.mulf %41, %40 : vector<2x16xf32>
    %43 = math.tanh %42 : vector<2x16xf32>
    %cst_30 = arith.constant 5.000000e-01 : f32
    %44 = vector.broadcast %cst_30 : f32 to vector<2x16xf32>
    %45 = arith.mulf %44, %43 : vector<2x16xf32>
    %cst_31 = arith.constant 5.000000e-01 : f32
    %46 = vector.broadcast %cst_31 : f32 to vector<2x16xf32>
    %47 = arith.addf %45, %46 : vector<2x16xf32>
    %48 = vector.extract_strided_slice %31 {offsets = [0, 32], sizes = [2, 16], strides = [1, 1]} : vector<2x64xf32> to vector<2x16xf32>
    %49 = math.tanh %48 : vector<2x16xf32>
    %50 = vector.extract_strided_slice %31 {offsets = [0, 48], sizes = [2, 16], strides = [1, 1]} : vector<2x64xf32> to vector<2x16xf32>
    %cst_32 = arith.constant 5.000000e-01 : f32
    %51 = vector.broadcast %cst_32 : f32 to vector<2x16xf32>
    %52 = arith.mulf %51, %50 : vector<2x16xf32>
    %53 = math.tanh %52 : vector<2x16xf32>
    %cst_33 = arith.constant 5.000000e-01 : f32
    %54 = vector.broadcast %cst_33 : f32 to vector<2x16xf32>
    %55 = arith.mulf %54, %53 : vector<2x16xf32>
    %cst_34 = arith.constant 5.000000e-01 : f32
    %56 = vector.broadcast %cst_34 : f32 to vector<2x16xf32>
    %57 = arith.addf %55, %56 : vector<2x16xf32>
    %58 = arith.mulf %47, %23 : vector<2x16xf32>
    %59 = arith.mulf %39, %49 : vector<2x16xf32>
    %60 = arith.addf %58, %59 : vector<2x16xf32>
    %61 = math.tanh %60 : vector<2x16xf32>
    %62 = arith.mulf %57, %61 : vector<2x16xf32>
    %63 = vector.broadcast %26 : i32 to vector<2x1xi32>
    %64 = arith.cmpi slt, %63, %17 : vector<2x1xi32>
    %65 = arith.extui %64 : vector<2x1xi1> to vector<2x1xi32>
    %66 = arith.sitofp %65 : vector<2x1xi32> to vector<2x1xf32>
    %67 = vector.broadcast %66 : vector<2x1xf32> to vector<2x16xf32>
    %68 = arith.mulf %62, %67 : vector<2x16xf32>
    %69 = vector.broadcast %66 : vector<2x1xf32> to vector<2x16xf32>
    %70 = arith.mulf %60, %69 : vector<2x16xf32>
    %c0_35 = arith.constant 0 : index
    %71 = arith.index_cast %25 : i32 to index
    %c0_36 = arith.constant 0 : index
    %c0_37 = arith.constant 0 : index
    %72 = vector.load %arg7[%c0_35, %71, %c0_36, %c0_37] : memref<1x8x2x16xf32, #tpu.memory_space<vmem>>, vector<1x1x2x16xf32>
    %73 = vector.shape_cast %72 : vector<1x1x2x16xf32> to vector<2x16xf32>
    %74 = vector.shape_cast %68 : vector<2x16xf32> to vector<1x1x2x16xf32>
    tpu.vector_store %arg7[%c0_35, %71, %c0_36, %c0_37], %74 {strides = array<i32>} : memref<1x8x2x16xf32, #tpu.memory_space<vmem>>, vector<1x1x2x16xf32>,
    %c1_i32_38 = arith.constant 1 : i32
    %c7_i32_39 = arith.constant 7 : i32
    %75 = arith.subi %c7_i32_39, %c1_i32_38 : i32
    %76 = arith.select %18, %75, %c1_i32_38 : i32
    %77 = arith.addi %21, %76 : i32
    %78 = arith.index_cast %76 : i32 to index
    %c0_40 = arith.constant 0 : index
    %c0_41 = arith.constant 0 : index
    %79 = vector.load %arg10[%78, %c0_40, %c0_41] : memref<8x2x64xf32, #tpu.memory_space<vmem>>, vector<1x2x64xf32>
    %80 = vector.shape_cast %79 : vector<1x2x64xf32> to vector<2x64xf32>
    %cst_42 = arith.constant dense<0.000000e+00> : vector<2x64xf32>
    %81 = tpu.matmul %68, %16, %cst_42 {dimension_numbers = #tpu.dot_dimension_numbers<[1], [0], [0], [1], [0, 0, 1, 1], [], []>} : vector<2x16xf32>, vector<16x64xf32>, vector<2x64xf32> -> vector<2x64xf32>
    %82 = arith.addf %80, %81 : vector<2x64xf32>
    %83 = vector.extract_strided_slice %82 {offsets = [0, 0], sizes = [2, 16], strides = [1, 1]} : vector<2x64xf32> to vector<2x16xf32>
    %cst_43 = arith.constant 5.000000e-01 : f32
    %84 = vector.broadcast %cst_43 : f32 to vector<2x16xf32>
    %85 = arith.mulf %84, %83 : vector<2x16xf32>
    %86 = math.tanh %85 : vector<2x16xf32>
    %cst_44 = arith.constant 5.000000e-01 : f32
    %87 = vector.broadcast %cst_44 : f32 to vector<2x16xf32>
    %88 = arith.mulf %87, %86 : vector<2x16xf32>
    %cst_45 = arith.constant 5.000000e-01 : f32
    %89 = vector.broadcast %cst_45 : f32 to vector<2x16xf32>
    %90 = arith.addf %88, %89 : vector<2x16xf32>
    %91 = vector.extract_strided_slice %82 {offsets = [0, 16], sizes = [2, 16], strides = [1, 1]} : vector<2x64xf32> to vector<2x16xf32>
    %cst_46 = arith.constant 5.000000e-01 : f32
    %92 = vector.broadcast %cst_46 : f32 to vector<2x16xf32>
    %93 = arith.mulf %92, %91 : vector<2x16xf32>
    %94 = math.tanh %93 : vector<2x16xf32>
    %cst_47 = arith.constant 5.000000e-01 : f32
    %95 = vector.broadcast %cst_47 : f32 to vector<2x16xf32>
    %96 = arith.mulf %95, %94 : vector<2x16xf32>
    %cst_48 = arith.constant 5.000000e-01 : f32
    %97 = vector.broadcast %cst_48 : f32 to vector<2x16xf32>
    %98 = arith.addf %96, %97 : vector<2x16xf32>
    %99 = vector.extract_strided_slice %82 {offsets = [0, 32], sizes = [2, 16], strides = [1, 1]} : vector<2x64xf32> to vector<2x16xf32>
    %100 = math.tanh %99 : vector<2x16xf32>
    %101 = vector.extract_strided_slice %82 {offsets = [0, 48], sizes = [2, 16], strides = [1, 1]} : vector<2x64xf32> to vector<2x16xf32>
    %cst_49 = arith.constant 5.000000e-01 : f32
    %102 = vector.broadcast %cst_49 : f32 to vector<2x16xf32>
    %103 = arith.mulf %102, %101 : vector<2x16xf32>
    %104 = math.tanh %103 : vector<2x16xf32>
    %cst_50 = arith.constant 5.000000e-01 : f32
    %105 = vector.broadcast %cst_50 : f32 to vector<2x16xf32>
    %106 = arith.mulf %105, %104 : vector<2x16xf32>
    %cst_51 = arith.constant 5.000000e-01 : f32
    %107 = vector.broadcast %cst_51 : f32 to vector<2x16xf32>
    %108 = arith.addf %106, %107 : vector<2x16xf32>
    %109 = arith.mulf %98, %70 : vector<2x16xf32>
    %110 = arith.mulf %90, %100 : vector<2x16xf32>
    %111 = arith.addf %109, %110 : vector<2x16xf32>
    %112 = math.tanh %111 : vector<2x16xf32>
    %113 = arith.mulf %108, %112 : vector<2x16xf32>
    %114 = vector.broadcast %77 : i32 to vector<2x1xi32>
    %115 = arith.cmpi slt, %114, %17 : vector<2x1xi32>
    %116 = arith.extui %115 : vector<2x1xi1> to vector<2x1xi32>
    %117 = arith.sitofp %116 : vector<2x1xi32> to vector<2x1xf32>
    %118 = vector.broadcast %117 : vector<2x1xf32> to vector<2x16xf32>
    %119 = arith.mulf %113, %118 : vector<2x16xf32>
    %120 = vector.broadcast %117 : vector<2x1xf32> to vector<2x16xf32>
    %121 = arith.mulf %111, %120 : vector<2x16xf32>
    %c0_52 = arith.constant 0 : index
    %122 = arith.index_cast %76 : i32 to index
    %c0_53 = arith.constant 0 : index
    %c0_54 = arith.constant 0 : index
    %123 = vector.load %arg7[%c0_52, %122, %c0_53, %c0_54] : memref<1x8x2x16xf32, #tpu.memory_space<vmem>>, vector<1x1x2x16xf32>
    %124 = vector.shape_cast %123 : vector<1x1x2x16xf32> to vector<2x16xf32>
    %125 = vector.shape_cast %119 : vector<2x16xf32> to vector<1x1x2x16xf32>
    tpu.vector_store %arg7[%c0_52, %122, %c0_53, %c0_54], %125 {strides = array<i32>} : memref<1x8x2x16xf32, #tpu.memory_space<vmem>>, vector<1x1x2x16xf32>,
    %c2_i32 = arith.constant 2 : i32
    %c7_i32_55 = arith.constant 7 : i32
    %126 = arith.subi %c7_i32_55, %c2_i32 : i32
    %127 = arith.select %18, %126, %c2_i32 : i32
    %128 = arith.addi %21, %127 : i32
    %129 = arith.index_cast %127 : i32 to index
    %c0_56 = arith.constant 0 : index
    %c0_57 = arith.constant 0 : index
    %130 = vector.load %arg10[%129, %c0_56, %c0_57] : memref<8x2x64xf32, #tpu.memory_space<vmem>>, vector<1x2x64xf32>
    %131 = vector.shape_cast %130 : vector<1x2x64xf32> to vector<2x64xf32>
    %cst_58 = arith.constant dense<0.000000e+00> : vector<2x64xf32>
    %132 = tpu.matmul %119, %16, %cst_58 {dimension_numbers = #tpu.dot_dimension_numbers<[1], [0], [0], [1], [0, 0, 1, 1], [], []>} : vector<2x16xf32>, vector<16x64xf32>, vector<2x64xf32> -> vector<2x64xf32>
    %133 = arith.addf %131, %132 : vector<2x64xf32>
    %134 = vector.extract_strided_slice %133 {offsets = [0, 0], sizes = [2, 16], strides = [1, 1]} : vector<2x64xf32> to vector<2x16xf32>
    %cst_59 = arith.constant 5.000000e-01 : f32
    %135 = vector.broadcast %cst_59 : f32 to vector<2x16xf32>
    %136 = arith.mulf %135, %134 : vector<2x16xf32>
    %137 = math.tanh %136 : vector<2x16xf32>
    %cst_60 = arith.constant 5.000000e-01 : f32
    %138 = vector.broadcast %cst_60 : f32 to vector<2x16xf32>
    %139 = arith.mulf %138, %137 : vector<2x16xf32>
    %cst_61 = arith.constant 5.000000e-01 : f32
    %140 = vector.broadcast %cst_61 : f32 to vector<2x16xf32>
    %141 = arith.addf %139, %140 : vector<2x16xf32>
    %142 = vector.extract_strided_slice %133 {offsets = [0, 16], sizes = [2, 16], strides = [1, 1]} : vector<2x64xf32> to vector<2x16xf32>
    %cst_62 = arith.constant 5.000000e-01 : f32
    %143 = vector.broadcast %cst_62 : f32 to vector<2x16xf32>
    %144 = arith.mulf %143, %142 : vector<2x16xf32>
    %145 = math.tanh %144 : vector<2x16xf32>
    %cst_63 = arith.constant 5.000000e-01 : f32
    %146 = vector.broadcast %cst_63 : f32 to vector<2x16xf32>
    %147 = arith.mulf %146, %145 : vector<2x16xf32>
    %cst_64 = arith.constant 5.000000e-01 : f32
    %148 = vector.broadcast %cst_64 : f32 to vector<2x16xf32>
    %149 = arith.addf %147, %148 : vector<2x16xf32>
    %150 = vector.extract_strided_slice %133 {offsets = [0, 32], sizes = [2, 16], strides = [1, 1]} : vector<2x64xf32> to vector<2x16xf32>
    %151 = math.tanh %150 : vector<2x16xf32>
    %152 = vector.extract_strided_slice %133 {offsets = [0, 48], sizes = [2, 16], strides = [1, 1]} : vector<2x64xf32> to vector<2x16xf32>
    %cst_65 = arith.constant 5.000000e-01 : f32
    %153 = vector.broadcast %cst_65 : f32 to vector<2x16xf32>
    %154 = arith.mulf %153, %152 : vector<2x16xf32>
    %155 = math.tanh %154 : vector<2x16xf32>
    %cst_66 = arith.constant 5.000000e-01 : f32
    %156 = vector.broadcast %cst_66 : f32 to vector<2x16xf32>
    %157 = arith.mulf %156, %155 : vector<2x16xf32>
    %cst_67 = arith.constant 5.000000e-01 : f32
    %158 = vector.broadcast %cst_67 : f32 to vector<2x16xf32>
    %159 = arith.addf %157, %158 : vector<2x16xf32>
    %160 = arith.mulf %149, %121 : vector<2x16xf32>
    %161 = arith.mulf %141, %151 : vector<2x16xf32>
    %162 = arith.addf %160, %161 : vector<2x16xf32>
    %163 = math.tanh %162 : vector<2x16xf32>
    %164 = arith.mulf %159, %163 : vector<2x16xf32>
    %165 = vector.broadcast %128 : i32 to vector<2x1xi32>
    %166 = arith.cmpi slt, %165, %17 : vector<2x1xi32>
    %167 = arith.extui %166 : vector<2x1xi1> to vector<2x1xi32>
    %168 = arith.sitofp %167 : vector<2x1xi32> to vector<2x1xf32>
    %169 = vector.broadcast %168 : vector<2x1xf32> to vector<2x16xf32>
    %170 = arith.mulf %164, %169 : vector<2x16xf32>
    %171 = vector.broadcast %168 : vector<2x1xf32> to vector<2x16xf32>
    %172 = arith.mulf %162, %171 : vector<2x16xf32>
    %c0_68 = arith.constant 0 : index
    %173 = arith.index_cast %127 : i32 to index
    %c0_69 = arith.constant 0 : index
    %c0_70 = arith.constant 0 : index
    %174 = vector.load %arg7[%c0_68, %173, %c0_69, %c0_70] : memref<1x8x2x16xf32, #tpu.memory_space<vmem>>, vector<1x1x2x16xf32>
    %175 = vector.shape_cast %174 : vector<1x1x2x16xf32> to vector<2x16xf32>
    %176 = vector.shape_cast %170 : vector<2x16xf32> to vector<1x1x2x16xf32>
    tpu.vector_store %arg7[%c0_68, %173, %c0_69, %c0_70], %176 {strides = array<i32>} : memref<1x8x2x16xf32, #tpu.memory_space<vmem>>, vector<1x1x2x16xf32>,
    %c3_i32 = arith.constant 3 : i32
    %c7_i32_71 = arith.constant 7 : i32
    %177 = arith.subi %c7_i32_71, %c3_i32 : i32
    %178 = arith.select %18, %177, %c3_i32 : i32
    %179 = arith.addi %21, %178 : i32
    %180 = arith.index_cast %178 : i32 to index
    %c0_72 = arith.constant 0 : index
    %c0_73 = arith.constant 0 : index
    %181 = vector.load %arg10[%180, %c0_72, %c0_73] : memref<8x2x64xf32, #tpu.memory_space<vmem>>, vector<1x2x64xf32>
    %182 = vector.shape_cast %181 : vector<1x2x64xf32> to vector<2x64xf32>
    %cst_74 = arith.constant dense<0.000000e+00> : vector<2x64xf32>
    %183 = tpu.matmul %170, %16, %cst_74 {dimension_numbers = #tpu.dot_dimension_numbers<[1], [0], [0], [1], [0, 0, 1, 1], [], []>} : vector<2x16xf32>, vector<16x64xf32>, vector<2x64xf32> -> vector<2x64xf32>
    %184 = arith.addf %182, %183 : vector<2x64xf32>
    %185 = vector.extract_strided_slice %184 {offsets = [0, 0], sizes = [2, 16], strides = [1, 1]} : vector<2x64xf32> to vector<2x16xf32>
    %cst_75 = arith.constant 5.000000e-01 : f32
    %186 = vector.broadcast %cst_75 : f32 to vector<2x16xf32>
    %187 = arith.mulf %186, %185 : vector<2x16xf32>
    %188 = math.tanh %187 : vector<2x16xf32>
    %cst_76 = arith.constant 5.000000e-01 : f32
    %189 = vector.broadcast %cst_76 : f32 to vector<2x16xf32>
    %190 = arith.mulf %189, %188 : vector<2x16xf32>
    %cst_77 = arith.constant 5.000000e-01 : f32
    %191 = vector.broadcast %cst_77 : f32 to vector<2x16xf32>
    %192 = arith.addf %190, %191 : vector<2x16xf32>
    %193 = vector.extract_strided_slice %184 {offsets = [0, 16], sizes = [2, 16], strides = [1, 1]} : vector<2x64xf32> to vector<2x16xf32>
    %cst_78 = arith.constant 5.000000e-01 : f32
    %194 = vector.broadcast %cst_78 : f32 to vector<2x16xf32>
    %195 = arith.mulf %194, %193 : vector<2x16xf32>
    %196 = math.tanh %195 : vector<2x16xf32>
    %cst_79 = arith.constant 5.000000e-01 : f32
    %197 = vector.broadcast %cst_79 : f32 to vector<2x16xf32>
    %198 = arith.mulf %197, %196 : vector<2x16xf32>
    %cst_80 = arith.constant 5.000000e-01 : f32
    %199 = vector.broadcast %cst_80 : f32 to vector<2x16xf32>
    %200 = arith.addf %198, %199 : vector<2x16xf32>
    %201 = vector.extract_strided_slice %184 {offsets = [0, 32], sizes = [2, 16], strides = [1, 1]} : vector<2x64xf32> to vector<2x16xf32>
    %202 = math.tanh %201 : vector<2x16xf32>
    %203 = vector.extract_strided_slice %184 {offsets = [0, 48], sizes = [2, 16], strides = [1, 1]} : vector<2x64xf32> to vector<2x16xf32>
    %cst_81 = arith.constant 5.000000e-01 : f32
    %204 = vector.broadcast %cst_81 : f32 to vector<2x16xf32>
    %205 = arith.mulf %204, %203 : vector<2x16xf32>
    %206 = math.tanh %205 : vector<2x16xf32>
    %cst_82 = arith.constant 5.000000e-01 : f32
    %207 = vector.broadcast %cst_82 : f32 to vector<2x16xf32>
    %208 = arith.mulf %207, %206 : vector<2x16xf32>
    %cst_83 = arith.constant 5.000000e-01 : f32
    %209 = vector.broadcast %cst_83 : f32 to vector<2x16xf32>
    %210 = arith.addf %208, %209 : vector<2x16xf32>
    %211 = arith.mulf %200, %172 : vector<2x16xf32>
    %212 = arith.mulf %192, %202 : vector<2x16xf32>
    %213 = arith.addf %211, %212 : vector<2x16xf32>
    %214 = math.tanh %213 : vector<2x16xf32>
    %215 = arith.mulf %210, %214 : vector<2x16xf32>
    %216 = vector.broadcast %179 : i32 to vector<2x1xi32>
    %217 = arith.cmpi slt, %216, %17 : vector<2x1xi32>
    %218 = arith.extui %217 : vector<2x1xi1> to vector<2x1xi32>
    %219 = arith.sitofp %218 : vector<2x1xi32> to vector<2x1xf32>
    %220 = vector.broadcast %219 : vector<2x1xf32> to vector<2x16xf32>
    %221 = arith.mulf %215, %220 : vector<2x16xf32>
    %222 = vector.broadcast %219 : vector<2x1xf32> to vector<2x16xf32>
    %223 = arith.mulf %213, %222 : vector<2x16xf32>
    %c0_84 = arith.constant 0 : index
    %224 = arith.index_cast %178 : i32 to index
    %c0_85 = arith.constant 0 : index
    %c0_86 = arith.constant 0 : index
    %225 = vector.load %arg7[%c0_84, %224, %c0_85, %c0_86] : memref<1x8x2x16xf32, #tpu.memory_space<vmem>>, vector<1x1x2x16xf32>
    %226 = vector.shape_cast %225 : vector<1x1x2x16xf32> to vector<2x16xf32>
    %227 = vector.shape_cast %221 : vector<2x16xf32> to vector<1x1x2x16xf32>
    tpu.vector_store %arg7[%c0_84, %224, %c0_85, %c0_86], %227 {strides = array<i32>} : memref<1x8x2x16xf32, #tpu.memory_space<vmem>>, vector<1x1x2x16xf32>,
    %c4_i32 = arith.constant 4 : i32
    %c7_i32_87 = arith.constant 7 : i32
    %228 = arith.subi %c7_i32_87, %c4_i32 : i32
    %229 = arith.select %18, %228, %c4_i32 : i32
    %230 = arith.addi %21, %229 : i32
    %231 = arith.index_cast %229 : i32 to index
    %c0_88 = arith.constant 0 : index
    %c0_89 = arith.constant 0 : index
    %232 = vector.load %arg10[%231, %c0_88, %c0_89] : memref<8x2x64xf32, #tpu.memory_space<vmem>>, vector<1x2x64xf32>
    %233 = vector.shape_cast %232 : vector<1x2x64xf32> to vector<2x64xf32>
    %cst_90 = arith.constant dense<0.000000e+00> : vector<2x64xf32>
    %234 = tpu.matmul %221, %16, %cst_90 {dimension_numbers = #tpu.dot_dimension_numbers<[1], [0], [0], [1], [0, 0, 1, 1], [], []>} : vector<2x16xf32>, vector<16x64xf32>, vector<2x64xf32> -> vector<2x64xf32>
    %235 = arith.addf %233, %234 : vector<2x64xf32>
    %236 = vector.extract_strided_slice %235 {offsets = [0, 0], sizes = [2, 16], strides = [1, 1]} : vector<2x64xf32> to vector<2x16xf32>
    %cst_91 = arith.constant 5.000000e-01 : f32
    %237 = vector.broadcast %cst_91 : f32 to vector<2x16xf32>
    %238 = arith.mulf %237, %236 : vector<2x16xf32>
    %239 = math.tanh %238 : vector<2x16xf32>
    %cst_92 = arith.constant 5.000000e-01 : f32
    %240 = vector.broadcast %cst_92 : f32 to vector<2x16xf32>
    %241 = arith.mulf %240, %239 : vector<2x16xf32>
    %cst_93 = arith.constant 5.000000e-01 : f32
    %242 = vector.broadcast %cst_93 : f32 to vector<2x16xf32>
    %243 = arith.addf %241, %242 : vector<2x16xf32>
    %244 = vector.extract_strided_slice %235 {offsets = [0, 16], sizes = [2, 16], strides = [1, 1]} : vector<2x64xf32> to vector<2x16xf32>
    %cst_94 = arith.constant 5.000000e-01 : f32
    %245 = vector.broadcast %cst_94 : f32 to vector<2x16xf32>
    %246 = arith.mulf %245, %244 : vector<2x16xf32>
    %247 = math.tanh %246 : vector<2x16xf32>
    %cst_95 = arith.constant 5.000000e-01 : f32
    %248 = vector.broadcast %cst_95 : f32 to vector<2x16xf32>
    %249 = arith.mulf %248, %247 : vector<2x16xf32>
    %cst_96 = arith.constant 5.000000e-01 : f32
    %250 = vector.broadcast %cst_96 : f32 to vector<2x16xf32>
    %251 = arith.addf %249, %250 : vector<2x16xf32>
    %252 = vector.extract_strided_slice %235 {offsets = [0, 32], sizes = [2, 16], strides = [1, 1]} : vector<2x64xf32> to vector<2x16xf32>
    %253 = math.tanh %252 : vector<2x16xf32>
    %254 = vector.extract_strided_slice %235 {offsets = [0, 48], sizes = [2, 16], strides = [1, 1]} : vector<2x64xf32> to vector<2x16xf32>
    %cst_97 = arith.constant 5.000000e-01 : f32
    %255 = vector.broadcast %cst_97 : f32 to vector<2x16xf32>
    %256 = arith.mulf %255, %254 : vector<2x16xf32>
    %257 = math.tanh %256 : vector<2x16xf32>
    %cst_98 = arith.constant 5.000000e-01 : f32
    %258 = vector.broadcast %cst_98 : f32 to vector<2x16xf32>
    %259 = arith.mulf %258, %257 : vector<2x16xf32>
    %cst_99 = arith.constant 5.000000e-01 : f32
    %260 = vector.broadcast %cst_99 : f32 to vector<2x16xf32>
    %261 = arith.addf %259, %260 : vector<2x16xf32>
    %262 = arith.mulf %251, %223 : vector<2x16xf32>
    %263 = arith.mulf %243, %253 : vector<2x16xf32>
    %264 = arith.addf %262, %263 : vector<2x16xf32>
    %265 = math.tanh %264 : vector<2x16xf32>
    %266 = arith.mulf %261, %265 : vector<2x16xf32>
    %267 = vector.broadcast %230 : i32 to vector<2x1xi32>
    %268 = arith.cmpi slt, %267, %17 : vector<2x1xi32>
    %269 = arith.extui %268 : vector<2x1xi1> to vector<2x1xi32>
    %270 = arith.sitofp %269 : vector<2x1xi32> to vector<2x1xf32>
    %271 = vector.broadcast %270 : vector<2x1xf32> to vector<2x16xf32>
    %272 = arith.mulf %266, %271 : vector<2x16xf32>
    %273 = vector.broadcast %270 : vector<2x1xf32> to vector<2x16xf32>
    %274 = arith.mulf %264, %273 : vector<2x16xf32>
    %c0_100 = arith.constant 0 : index
    %275 = arith.index_cast %229 : i32 to index
    %c0_101 = arith.constant 0 : index
    %c0_102 = arith.constant 0 : index
    %276 = vector.load %arg7[%c0_100, %275, %c0_101, %c0_102] : memref<1x8x2x16xf32, #tpu.memory_space<vmem>>, vector<1x1x2x16xf32>
    %277 = vector.shape_cast %276 : vector<1x1x2x16xf32> to vector<2x16xf32>
    %278 = vector.shape_cast %272 : vector<2x16xf32> to vector<1x1x2x16xf32>
    tpu.vector_store %arg7[%c0_100, %275, %c0_101, %c0_102], %278 {strides = array<i32>} : memref<1x8x2x16xf32, #tpu.memory_space<vmem>>, vector<1x1x2x16xf32>,
    %c5_i32 = arith.constant 5 : i32
    %c7_i32_103 = arith.constant 7 : i32
    %279 = arith.subi %c7_i32_103, %c5_i32 : i32
    %280 = arith.select %18, %279, %c5_i32 : i32
    %281 = arith.addi %21, %280 : i32
    %282 = arith.index_cast %280 : i32 to index
    %c0_104 = arith.constant 0 : index
    %c0_105 = arith.constant 0 : index
    %283 = vector.load %arg10[%282, %c0_104, %c0_105] : memref<8x2x64xf32, #tpu.memory_space<vmem>>, vector<1x2x64xf32>
    %284 = vector.shape_cast %283 : vector<1x2x64xf32> to vector<2x64xf32>
    %cst_106 = arith.constant dense<0.000000e+00> : vector<2x64xf32>
    %285 = tpu.matmul %272, %16, %cst_106 {dimension_numbers = #tpu.dot_dimension_numbers<[1], [0], [0], [1], [0, 0, 1, 1], [], []>} : vector<2x16xf32>, vector<16x64xf32>, vector<2x64xf32> -> vector<2x64xf32>
    %286 = arith.addf %284, %285 : vector<2x64xf32>
    %287 = vector.extract_strided_slice %286 {offsets = [0, 0], sizes = [2, 16], strides = [1, 1]} : vector<2x64xf32> to vector<2x16xf32>
    %cst_107 = arith.constant 5.000000e-01 : f32
    %288 = vector.broadcast %cst_107 : f32 to vector<2x16xf32>
    %289 = arith.mulf %288, %287 : vector<2x16xf32>
    %290 = math.tanh %289 : vector<2x16xf32>
    %cst_108 = arith.constant 5.000000e-01 : f32
    %291 = vector.broadcast %cst_108 : f32 to vector<2x16xf32>
    %292 = arith.mulf %291, %290 : vector<2x16xf32>
    %cst_109 = arith.constant 5.000000e-01 : f32
    %293 = vector.broadcast %cst_109 : f32 to vector<2x16xf32>
    %294 = arith.addf %292, %293 : vector<2x16xf32>
    %295 = vector.extract_strided_slice %286 {offsets = [0, 16], sizes = [2, 16], strides = [1, 1]} : vector<2x64xf32> to vector<2x16xf32>
    %cst_110 = arith.constant 5.000000e-01 : f32
    %296 = vector.broadcast %cst_110 : f32 to vector<2x16xf32>
    %297 = arith.mulf %296, %295 : vector<2x16xf32>
    %298 = math.tanh %297 : vector<2x16xf32>
    %cst_111 = arith.constant 5.000000e-01 : f32
    %299 = vector.broadcast %cst_111 : f32 to vector<2x16xf32>
    %300 = arith.mulf %299, %298 : vector<2x16xf32>
    %cst_112 = arith.constant 5.000000e-01 : f32
    %301 = vector.broadcast %cst_112 : f32 to vector<2x16xf32>
    %302 = arith.addf %300, %301 : vector<2x16xf32>
    %303 = vector.extract_strided_slice %286 {offsets = [0, 32], sizes = [2, 16], strides = [1, 1]} : vector<2x64xf32> to vector<2x16xf32>
    %304 = math.tanh %303 : vector<2x16xf32>
    %305 = vector.extract_strided_slice %286 {offsets = [0, 48], sizes = [2, 16], strides = [1, 1]} : vector<2x64xf32> to vector<2x16xf32>
    %cst_113 = arith.constant 5.000000e-01 : f32
    %306 = vector.broadcast %cst_113 : f32 to vector<2x16xf32>
    %307 = arith.mulf %306, %305 : vector<2x16xf32>
    %308 = math.tanh %307 : vector<2x16xf32>
    %cst_114 = arith.constant 5.000000e-01 : f32
    %309 = vector.broadcast %cst_114 : f32 to vector<2x16xf32>
    %310 = arith.mulf %309, %308 : vector<2x16xf32>
    %cst_115 = arith.constant 5.000000e-01 : f32
    %311 = vector.broadcast %cst_115 : f32 to vector<2x16xf32>
    %312 = arith.addf %310, %311 : vector<2x16xf32>
    %313 = arith.mulf %302, %274 : vector<2x16xf32>
    %314 = arith.mulf %294, %304 : vector<2x16xf32>
    %315 = arith.addf %313, %314 : vector<2x16xf32>
    %316 = math.tanh %315 : vector<2x16xf32>
    %317 = arith.mulf %312, %316 : vector<2x16xf32>
    %318 = vector.broadcast %281 : i32 to vector<2x1xi32>
    %319 = arith.cmpi slt, %318, %17 : vector<2x1xi32>
    %320 = arith.extui %319 : vector<2x1xi1> to vector<2x1xi32>
    %321 = arith.sitofp %320 : vector<2x1xi32> to vector<2x1xf32>
    %322 = vector.broadcast %321 : vector<2x1xf32> to vector<2x16xf32>
    %323 = arith.mulf %317, %322 : vector<2x16xf32>
    %324 = vector.broadcast %321 : vector<2x1xf32> to vector<2x16xf32>
    %325 = arith.mulf %315, %324 : vector<2x16xf32>
    %c0_116 = arith.constant 0 : index
    %326 = arith.index_cast %280 : i32 to index
    %c0_117 = arith.constant 0 : index
    %c0_118 = arith.constant 0 : index
    %327 = vector.load %arg7[%c0_116, %326, %c0_117, %c0_118] : memref<1x8x2x16xf32, #tpu.memory_space<vmem>>, vector<1x1x2x16xf32>
    %328 = vector.shape_cast %327 : vector<1x1x2x16xf32> to vector<2x16xf32>
    %329 = vector.shape_cast %323 : vector<2x16xf32> to vector<1x1x2x16xf32>
    tpu.vector_store %arg7[%c0_116, %326, %c0_117, %c0_118], %329 {strides = array<i32>} : memref<1x8x2x16xf32, #tpu.memory_space<vmem>>, vector<1x1x2x16xf32>,
    %c6_i32 = arith.constant 6 : i32
    %c7_i32_119 = arith.constant 7 : i32
    %330 = arith.subi %c7_i32_119, %c6_i32 : i32
    %331 = arith.select %18, %330, %c6_i32 : i32
    %332 = arith.addi %21, %331 : i32
    %333 = arith.index_cast %331 : i32 to index
    %c0_120 = arith.constant 0 : index
    %c0_121 = arith.constant 0 : index
    %334 = vector.load %arg10[%333, %c0_120, %c0_121] : memref<8x2x64xf32, #tpu.memory_space<vmem>>, vector<1x2x64xf32>
    %335 = vector.shape_cast %334 : vector<1x2x64xf32> to vector<2x64xf32>
    %cst_122 = arith.constant dense<0.000000e+00> : vector<2x64xf32>
    %336 = tpu.matmul %323, %16, %cst_122 {dimension_numbers = #tpu.dot_dimension_numbers<[1], [0], [0], [1], [0, 0, 1, 1], [], []>} : vector<2x16xf32>, vector<16x64xf32>, vector<2x64xf32> -> vector<2x64xf32>
    %337 = arith.addf %335, %336 : vector<2x64xf32>
    %338 = vector.extract_strided_slice %337 {offsets = [0, 0], sizes = [2, 16], strides = [1, 1]} : vector<2x64xf32> to vector<2x16xf32>
    %cst_123 = arith.constant 5.000000e-01 : f32
    %339 = vector.broadcast %cst_123 : f32 to vector<2x16xf32>
    %340 = arith.mulf %339, %338 : vector<2x16xf32>
    %341 = math.tanh %340 : vector<2x16xf32>
    %cst_124 = arith.constant 5.000000e-01 : f32
    %342 = vector.broadcast %cst_124 : f32 to vector<2x16xf32>
    %343 = arith.mulf %342, %341 : vector<2x16xf32>
    %cst_125 = arith.constant 5.000000e-01 : f32
    %344 = vector.broadcast %cst_125 : f32 to vector<2x16xf32>
    %345 = arith.addf %343, %344 : vector<2x16xf32>
    %346 = vector.extract_strided_slice %337 {offsets = [0, 16], sizes = [2, 16], strides = [1, 1]} : vector<2x64xf32> to vector<2x16xf32>
    %cst_126 = arith.constant 5.000000e-01 : f32
    %347 = vector.broadcast %cst_126 : f32 to vector<2x16xf32>
    %348 = arith.mulf %347, %346 : vector<2x16xf32>
    %349 = math.tanh %348 : vector<2x16xf32>
    %cst_127 = arith.constant 5.000000e-01 : f32
    %350 = vector.broadcast %cst_127 : f32 to vector<2x16xf32>
    %351 = arith.mulf %350, %349 : vector<2x16xf32>
    %cst_128 = arith.constant 5.000000e-01 : f32
    %352 = vector.broadcast %cst_128 : f32 to vector<2x16xf32>
    %353 = arith.addf %351, %352 : vector<2x16xf32>
    %354 = vector.extract_strided_slice %337 {offsets = [0, 32], sizes = [2, 16], strides = [1, 1]} : vector<2x64xf32> to vector<2x16xf32>
    %355 = math.tanh %354 : vector<2x16xf32>
    %356 = vector.extract_strided_slice %337 {offsets = [0, 48], sizes = [2, 16], strides = [1, 1]} : vector<2x64xf32> to vector<2x16xf32>
    %cst_129 = arith.constant 5.000000e-01 : f32
    %357 = vector.broadcast %cst_129 : f32 to vector<2x16xf32>
    %358 = arith.mulf %357, %356 : vector<2x16xf32>
    %359 = math.tanh %358 : vector<2x16xf32>
    %cst_130 = arith.constant 5.000000e-01 : f32
    %360 = vector.broadcast %cst_130 : f32 to vector<2x16xf32>
    %361 = arith.mulf %360, %359 : vector<2x16xf32>
    %cst_131 = arith.constant 5.000000e-01 : f32
    %362 = vector.broadcast %cst_131 : f32 to vector<2x16xf32>
    %363 = arith.addf %361, %362 : vector<2x16xf32>
    %364 = arith.mulf %353, %325 : vector<2x16xf32>
    %365 = arith.mulf %345, %355 : vector<2x16xf32>
    %366 = arith.addf %364, %365 : vector<2x16xf32>
    %367 = math.tanh %366 : vector<2x16xf32>
    %368 = arith.mulf %363, %367 : vector<2x16xf32>
    %369 = vector.broadcast %332 : i32 to vector<2x1xi32>
    %370 = arith.cmpi slt, %369, %17 : vector<2x1xi32>
    %371 = arith.extui %370 : vector<2x1xi1> to vector<2x1xi32>
    %372 = arith.sitofp %371 : vector<2x1xi32> to vector<2x1xf32>
    %373 = vector.broadcast %372 : vector<2x1xf32> to vector<2x16xf32>
    %374 = arith.mulf %368, %373 : vector<2x16xf32>
    %375 = vector.broadcast %372 : vector<2x1xf32> to vector<2x16xf32>
    %376 = arith.mulf %366, %375 : vector<2x16xf32>
    %c0_132 = arith.constant 0 : index
    %377 = arith.index_cast %331 : i32 to index
    %c0_133 = arith.constant 0 : index
    %c0_134 = arith.constant 0 : index
    %378 = vector.load %arg7[%c0_132, %377, %c0_133, %c0_134] : memref<1x8x2x16xf32, #tpu.memory_space<vmem>>, vector<1x1x2x16xf32>
    %379 = vector.shape_cast %378 : vector<1x1x2x16xf32> to vector<2x16xf32>
    %380 = vector.shape_cast %374 : vector<2x16xf32> to vector<1x1x2x16xf32>
    tpu.vector_store %arg7[%c0_132, %377, %c0_133, %c0_134], %380 {strides = array<i32>} : memref<1x8x2x16xf32, #tpu.memory_space<vmem>>, vector<1x1x2x16xf32>,
    %c7_i32_135 = arith.constant 7 : i32
    %c7_i32_136 = arith.constant 7 : i32
    %381 = arith.subi %c7_i32_136, %c7_i32_135 : i32
    %382 = arith.select %18, %381, %c7_i32_135 : i32
    %383 = arith.addi %21, %382 : i32
    %384 = arith.index_cast %382 : i32 to index
    %c0_137 = arith.constant 0 : index
    %c0_138 = arith.constant 0 : index
    %385 = vector.load %arg10[%384, %c0_137, %c0_138] : memref<8x2x64xf32, #tpu.memory_space<vmem>>, vector<1x2x64xf32>
    %386 = vector.shape_cast %385 : vector<1x2x64xf32> to vector<2x64xf32>
    %cst_139 = arith.constant dense<0.000000e+00> : vector<2x64xf32>
    %387 = tpu.matmul %374, %16, %cst_139 {dimension_numbers = #tpu.dot_dimension_numbers<[1], [0], [0], [1], [0, 0, 1, 1], [], []>} : vector<2x16xf32>, vector<16x64xf32>, vector<2x64xf32> -> vector<2x64xf32>
    %388 = arith.addf %386, %387 : vector<2x64xf32>
    %389 = vector.extract_strided_slice %388 {offsets = [0, 0], sizes = [2, 16], strides = [1, 1]} : vector<2x64xf32> to vector<2x16xf32>
    %cst_140 = arith.constant 5.000000e-01 : f32
    %390 = vector.broadcast %cst_140 : f32 to vector<2x16xf32>
    %391 = arith.mulf %390, %389 : vector<2x16xf32>
    %392 = math.tanh %391 : vector<2x16xf32>
    %cst_141 = arith.constant 5.000000e-01 : f32
    %393 = vector.broadcast %cst_141 : f32 to vector<2x16xf32>
    %394 = arith.mulf %393, %392 : vector<2x16xf32>
    %cst_142 = arith.constant 5.000000e-01 : f32
    %395 = vector.broadcast %cst_142 : f32 to vector<2x16xf32>
    %396 = arith.addf %394, %395 : vector<2x16xf32>
    %397 = vector.extract_strided_slice %388 {offsets = [0, 16], sizes = [2, 16], strides = [1, 1]} : vector<2x64xf32> to vector<2x16xf32>
    %cst_143 = arith.constant 5.000000e-01 : f32
    %398 = vector.broadcast %cst_143 : f32 to vector<2x16xf32>
    %399 = arith.mulf %398, %397 : vector<2x16xf32>
    %400 = math.tanh %399 : vector<2x16xf32>
    %cst_144 = arith.constant 5.000000e-01 : f32
    %401 = vector.broadcast %cst_144 : f32 to vector<2x16xf32>
    %402 = arith.mulf %401, %400 : vector<2x16xf32>
    %cst_145 = arith.constant 5.000000e-01 : f32
    %403 = vector.broadcast %cst_145 : f32 to vector<2x16xf32>
    %404 = arith.addf %402, %403 : vector<2x16xf32>
    %405 = vector.extract_strided_slice %388 {offsets = [0, 32], sizes = [2, 16], strides = [1, 1]} : vector<2x64xf32> to vector<2x16xf32>
    %406 = math.tanh %405 : vector<2x16xf32>
    %407 = vector.extract_strided_slice %388 {offsets = [0, 48], sizes = [2, 16], strides = [1, 1]} : vector<2x64xf32> to vector<2x16xf32>
    %cst_146 = arith.constant 5.000000e-01 : f32
    %408 = vector.broadcast %cst_146 : f32 to vector<2x16xf32>
    %409 = arith.mulf %408, %407 : vector<2x16xf32>
    %410 = math.tanh %409 : vector<2x16xf32>
    %cst_147 = arith.constant 5.000000e-01 : f32
    %411 = vector.broadcast %cst_147 : f32 to vector<2x16xf32>
    %412 = arith.mulf %411, %410 : vector<2x16xf32>
    %cst_148 = arith.constant 5.000000e-01 : f32
    %413 = vector.broadcast %cst_148 : f32 to vector<2x16xf32>
    %414 = arith.addf %412, %413 : vector<2x16xf32>
    %415 = arith.mulf %404, %376 : vector<2x16xf32>
    %416 = arith.mulf %396, %406 : vector<2x16xf32>
    %417 = arith.addf %415, %416 : vector<2x16xf32>
    %418 = math.tanh %417 : vector<2x16xf32>
    %419 = arith.mulf %414, %418 : vector<2x16xf32>
    %420 = vector.broadcast %383 : i32 to vector<2x1xi32>
    %421 = arith.cmpi slt, %420, %17 : vector<2x1xi32>
    %422 = arith.extui %421 : vector<2x1xi1> to vector<2x1xi32>
    %423 = arith.sitofp %422 : vector<2x1xi32> to vector<2x1xf32>
    %424 = vector.broadcast %423 : vector<2x1xf32> to vector<2x16xf32>
    %425 = arith.mulf %419, %424 : vector<2x16xf32>
    %426 = vector.broadcast %423 : vector<2x1xf32> to vector<2x16xf32>
    %427 = arith.mulf %417, %426 : vector<2x16xf32>
    %c0_149 = arith.constant 0 : index
    %428 = arith.index_cast %382 : i32 to index
    %c0_150 = arith.constant 0 : index
    %c0_151 = arith.constant 0 : index
    %429 = vector.load %arg7[%c0_149, %428, %c0_150, %c0_151] : memref<1x8x2x16xf32, #tpu.memory_space<vmem>>, vector<1x1x2x16xf32>
    %430 = vector.shape_cast %429 : vector<1x1x2x16xf32> to vector<2x16xf32>
    %431 = vector.shape_cast %425 : vector<2x16xf32> to vector<1x1x2x16xf32>
    tpu.vector_store %arg7[%c0_149, %428, %c0_150, %c0_151], %431 {strides = array<i32>} : memref<1x8x2x16xf32, #tpu.memory_space<vmem>>, vector<1x1x2x16xf32>,
    %c8_i32_152 = arith.constant 8 : i32
    %c0_153 = arith.constant 0 : index
    %c0_154 = arith.constant 0 : index
    %432 = vector.load %arg8[%c0_153, %c0_154] : memref<2x16xf32, #tpu.memory_space<vmem>>, vector<2x16xf32>
    tpu.vector_store %arg8[%c0_153, %c0_154], %425 {strides = array<i32>} : memref<2x16xf32, #tpu.memory_space<vmem>>, vector<2x16xf32>,
    %c0_155 = arith.constant 0 : index
    %c0_156 = arith.constant 0 : index
    %433 = vector.load %arg9[%c0_155, %c0_156] : memref<2x16xf32, #tpu.memory_space<vmem>>, vector<2x16xf32>
    tpu.vector_store %arg9[%c0_155, %c0_156], %427 {strides = array<i32>} : memref<2x16xf32, #tpu.memory_space<vmem>>, vector<2x16xf32>,
    return
  }
  func.func @transform_0(%arg0: i32, %arg1: i32) -> (i32, i32) {
    %c0_i32 = arith.constant 0 : i32
    %c0_i32_0 = arith.constant 0 : i32
    %c0_i32_1 = arith.constant 0 : i32
    return %c0_i32, %c0_i32_0 : i32, i32
  }
  func.func @transform_1(%arg0: i32, %arg1: i32) -> (i32, i32, i32) {
    %c2_i32 = arith.constant 2 : i32
    %0 = arith.muli %c2_i32, %arg1 : i32
    %c1_i32 = arith.constant 1 : i32
    %1 = arith.subi %c1_i32, %0 : i32
    %2 = arith.muli %arg0, %1 : i32
    %3 = arith.addi %arg1, %2 : i32
    %c0_i32 = arith.constant 0 : i32
    %c0_i32_0 = arith.constant 0 : i32
    %c0_i32_1 = arith.constant 0 : i32
    return %3, %c0_i32, %c0_i32_0 : i32, i32, i32
  }
  func.func @transform_2(%arg0: i32, %arg1: i32) -> (i32, i32, i32) {
    %c0_i32 = arith.constant 0 : i32
    %c0_i32_0 = arith.constant 0 : i32
    %c0_i32_1 = arith.constant 0 : i32
    return %arg0, %c0_i32, %c0_i32_0 : i32, i32, i32
  }
  func.func @transform_3(%arg0: i32, %arg1: i32) -> (i32, i32, i32) {
    %c0_i32 = arith.constant 0 : i32
    %c0_i32_0 = arith.constant 0 : i32
    %c0_i32_1 = arith.constant 0 : i32
    return %arg0, %c0_i32, %c0_i32_0 : i32, i32, i32
  }
  func.func @transform_4(%arg0: i32, %arg1: i32) -> (i32, i32, i32) {
    %c0_i32 = arith.constant 0 : i32
    %c0_i32_0 = arith.constant 0 : i32
    %c0_i32_1 = arith.constant 0 : i32
    return %arg0, %c0_i32, %c0_i32_0 : i32, i32, i32
  }
  func.func @transform_5(%arg0: i32, %arg1: i32) -> (i32, i32, i32, i32) {
    %c2_i32 = arith.constant 2 : i32
    %0 = arith.muli %c2_i32, %arg1 : i32
    %c1_i32 = arith.constant 1 : i32
    %1 = arith.subi %c1_i32, %0 : i32
    %2 = arith.muli %arg0, %1 : i32
    %3 = arith.addi %arg1, %2 : i32
    %c0_i32 = arith.constant 0 : i32
    %c0_i32_0 = arith.constant 0 : i32
    %c0_i32_1 = arith.constant 0 : i32
    return %arg0, %3, %c0_i32, %c0_i32_0 : i32, i32, i32, i32
  }
}

</mosaic_0001>

<bundles_post_ra>
// kernel: tpu_custom_call.1
= control target key start
LH: loop header
LB: loop body
LE: loop exit
PB: predicated region body
PF: predicated region fallthrough
CT: control target
= control target key end

     0   :  { %s2983_s0 = inlined_call_operand.vmem [shape: s32[2,1], index: 0, kind: input, shape index: {}]   ;;  %s2984_s1 = inlined_call_operand.hbm [shape: f32[16,2,24], index: 1, kind: input, shape index: {}]   ;;  %s2985_s2 = inlined_call_operand.hbm [shape: f32[2,24,64], index: 2, kind: input, shape index: {}]   ;;  %s2986_s3 = inlined_call_operand.hbm [shape: f32[2,16,64], index: 3, kind: input, shape index: {}]   ;;  %s2987_s4 = inlined_call_operand.vmem [shape: f32[2,1,64], index: 4, kind: input, shape index: {}]   ;;  %s2988_s5 = inlined_call_operand.hbm [shape: f32[2,16,2,16], index: 5, kind: output, shape index: {}]  }
   0x1   :  { %3011 = sst [smem:[#allocation27_spill]] %s2983_s0 }
   0x2   :  { %3012 = sst [smem:[#allocation28_spill]] %s2984_s1 }
   0x3   :  { %3013 = sst [smem:[#allocation29_spill]] %s2985_s2 }
   0x4   :  { %3014 = sst [smem:[#allocation30_spill]] %s2987_s4 }
   0x5   :  { %3015 = sst [smem:[#allocation31_spill]] %s2988_s5 }
   0x6   :  { %10 = vsyncpa [#allocation6], 0 }
   0x7   :  { %12 = vsyncpa [#allocation6 + $0x1], 0 }
   0x8   :  { %13 = vsyncpa [#allocation9], 0 }
   0x9   :  { %15 = vsyncpa [#allocation9 + $0x1], 0 }
   0xa   :  { %16 = vsyncpa [#allocation7], 0 }
   0xb   :  { %18 = vsyncpa [#allocation7 + $0x1], 0  ;;  %s2376_s18 = smov 0   ;;  %s2378_s19 = smov 0  }
   0xc   :  { %s2380_s20 = smov 0   ;;  %s2382_s21 = smov 0  }
   0xd   :  { %s2384_s22 = smov 0   ;;  %s2386_s23 = smov 0  }
   0xe   :  { %s2388_s24 = smov 0   ;;  %s2390_s25 = smov 0  }
   0xf   :  { %s2392_s26 = smov 0   ;;  %s2394_s27 = smov 0  }
  0x10   :  { %s2396_s28 = smov 0   ;;  %s2398_s29 = smov 0  }
  0x11   :  { %s2400_s30 = smov 0   ;;  %s2402_s6 = smov 0  }
  0x12 LB: > { %3016 = sst [smem:[#allocation15_spill]] %s2281_s20  ;;  %s2445_s7 = sadd.s32 4294967295, %s2325_s6   ;;  %s2325_s6 = sphi %s2402_s6, %s24_s6   ;;  %s2321_s30 = sphi %s2400_s30, %s3078_s30   ;;  %s2317_s29 = sphi %s2398_s29, %s3069_s29   ;;  %s2313_s28 = sphi %s2396_s28, %s3077_s28   ;;  %s2309_s27 = sphi %s2394_s27, %s3068_s27   ;;  %s2305_s26 = sphi %s2392_s26, %s3067_s26   ;;  %s2301_s25 = sphi %s2390_s25, %s3076_s25   ;;  %s2297_s24 = sphi %s2388_s24, %s3075_s24   ;;  %s2293_s23 = sphi %s2386_s23, %s3065_s23   ;;  %s2289_s22 = sphi %s2384_s22, %s3074_s22   ;;  %s2285_s21 = sphi %s2382_s21, %s3073_s21   ;;  %s2281_s20 = sphi %s2380_s20, %s3063_s20   ;;  %s2277_s19 = sphi %s2378_s19, %s3072_s19   ;;  %s2273_s18 = sphi %s2376_s18, %s3071_s18  }
  0x13   : > { %3017 = sst [smem:[#allocation16_spill]] %s2293_s23  ;;  %p80_p0 = scmp.eq.s32.totalorder %s2325_s6, 0 }
  0x14   : > { %3018 = sst [smem:[#allocation17_spill]] %s2305_s26  ;;  %p86_p1 = scmp.eq.s32.totalorder %s2445_s7, 0 }
  0x15   : > { %3019 = sst [smem:[#allocation18_spill]] %s2309_s27  ;;  %p105_p2 = scmp.ne.s32.totalorder %s2293_s23, %s2289_s22 }
  0x16   : > { %3020 = sst [smem:[#allocation19_spill]] %s2313_s28  ;;  %p111_p3 = scmp.ne.s32.totalorder %s2289_s22, %s2285_s21 }
  0x17   : > { %3021 = sst [smem:[#allocation20_spill]] %s2317_s29  ;;  %p3001_p4 = scmp.lt.s32.totalorder %s2325_s6, 4 }
  0x18   : > { %p107_p5 = por %p105_p2, %p80_p0  ;;  %p2458_p6 = por %p111_p3, %p86_p1 }
  0x19   : > { %s251_s10 = sand.u32 1, %s2325_s6   ;;  %s253_s11 = sand.u32 1, %s2293_s23  }
  0x1a   : > { %s3022_s9 = scalar_select %p2458_p6, 1, 0 }
  0x1b   : > { %s1889_s12 = smul.u32 24, %s253_s11  ;;  %p2467_p7 = pnand %p3001_p4, %p107_p5 }
  0x1c   : > { %3023 = sst [smem:[#allocation21_spill]] %s3022_s9  ;;  %s1890_s13 = smul.u32 384, %s2321_s30 }
  0x1d   : > { %s3024_s14 = scalar_select %p2467_p7, 1, 0 }
  0x1e   : > { %s3025_s2 = sld [smem:[#allocation29_spill]]  ;;  %s255_s21 = scalar_lea.vmem [#allocation8], %s1889_s12 }
  0x1f   : > { %s262_s8 = sshll.u32 %s255_s21, 4  ;;  %s2474_s5 = sshll.u32 %s253_s11, 4  ;;  %s263_s8 = int_to_ptr.vmem [resolvable:$true] %s262_s8 }
  0x20   : > { %s2476_s0 = scalar_lea.sflag [#allocation9], %s251_s10  ;;  %p2998_p8 = pneg %p2467_p7 }
  0x21   : > { %s2106_s27 = scalar_lea.vmem %s263_s8, 384  ;;  %s2327_s4 = smov [#allocation8]  }
  0x22   : > { %p2107_p9 = scmp.ne.s32.totalorder %s263_s8, %s2106_s27  ;;  %s2111_s15 = sshll.u32 %s2327_s4, 4  ;;  %s2112_s15 = int_to_ptr.vmem [resolvable:$false] %s2111_s15 }
  0x23   : > { %s2113_s16 = scalar_lea.vmem %s2112_s15, 768  ;;  %p2114_p12 = scmp.lt.s32.totalorder %s263_s8, %s2112_s15 }
  0x24   : > { %s261_s17 = scalar_lea.hbm %s3025_s2, %s1890_s13  ;;  %p2109_p10 = pnand %p2107_p9, %p2998_p8 }
  0x25   : > { %p2115_p13 = scmp.lt.s32.totalorder %s2113_s16, %s2106_s27 }
  0x26   : > { %p2110_p11 = pneg %p2109_p10 }
  0x27   : > { %p2116_p2 = por %p2115_p13, %p2114_p12 }
  0x29   : > { %p2117_p3 = pnand %p2116_p2, %p2110_p11 }
  0x2b   : > { %2120 = shalt.err (!%p2117_p3)
}
  0x2c   : > { %s2991_s11 = smov 128   ;;  %s2992_s10 = smov 8  }
  0x2d   : > { %1906 = dma.hbm_to_vmem [thread:$0]  (!%p2467_p7), %s261_s17, 384, %s263_s8, %s2476_s0, %s2991_s11, %s2991_s11, %s2992_s10  }
  0x2e   : > { %p1753_p5 = scmp.ge.s32.totalorder %s2325_s6, 1  ;;  %p297_p9 = scmp.lt.s32.totalorder %s2325_s6, 5 }
  0x2f   : > { %s33_s12 = sadd.s32 1, %s2317_s29  ;;  %s36_s13 = sadd.s32 1, %s2321_s30 }
  0x30   : > { %p2491_p10 = pnand %p1753_p5, %p297_p9  ;;  %p34_p11 = scmp.ge.s32.totalorder %s33_s12, 2 }
  0x31   : > { %s1739_s21 = sshll.u32 %s2317_s29, 1  ;;  %s72_s8 = sadd.s32 1, %s2305_s26 }
  0x32   : > { %s3026_s4 = scalar_select %p2491_p10, 1, 0 }
  0x33   : > { %s3080_s12 = smov (%p34_p11, %s33_s12), 0  ;;  %s3082_s13 = smov (!%p34_p11, %s36_s13), %s2321_s30 }
  0x34   : > { %3027 = sst [smem:[#allocation22_spill]] %s3080_s12  ;;  %s62_s17 = ssub.s32 1, %s1739_s21 }
  0x35   : > { %s1740_s15 = sshll.u32 %s3080_s12, 1  ;;  %p38_p12 = scmp.ge.s32.totalorder %s3082_s13, 2 }
  0x36   : > { %s63_s16 = smul.u32 %s2321_s30, %s62_s17  ;;  %s66_s11 = ssub.s32 1, %s1740_s15 }
  0x37   : > { %p79_p13 = scmp.ne.s32.totalorder %s2305_s26, %s2301_s25  ;;  %s3084_s13 = smov (%p38_p12, %s3082_s13), 0 }
  0x38   : > { %3028 = sst [smem:[#allocation23_spill]] %s3084_s13  ;;  %s64_s10 = sadd.s32 %s2317_s29, %s63_s16 }
  0x39   : > { %p2512_p2 = por %p80_p0, %p79_p13  ;;  %s67_s21 = smul.u32 %s66_s11, %s3084_s13 }
  0x3a   : > { %p85_p3 = scmp.ne.s32.totalorder %s2301_s25, %s2297_s24  ;;  %s95_s17 = ssub.s32 %s2321_s30, %s3084_s13 }
  0x3b   : > { %s186_s15 = sadd.s32 1, %s2281_s20  ;;  %s68_s2 = sadd.s32 %s67_s21, %s3080_s12 }
  0x3c   : > { %p2525_p5 = por %p86_p1, %p85_p3  ;;  %s69_s16 = ssub.s32 %s64_s10, %s68_s2 }
  0x3d   : > { %p96_p0 = scmp.eq.s32.totalorder %s95_s17, 0  ;;  %p70_p9 = scmp.eq.s32.totalorder %s69_s16, 0 }
  0x3e   : > { %s3030_s28 = scalar_select %p2525_p5, 1, 0 }
  0x3f   : > { %s183_s29 = sor.u32 %s95_s17, %s69_s16  ;;  %s3031_s9 = sadd.s32 1, %s2293_s23 }
  0x40   : > { %s2532_s11 = scalar_select %p96_p0, %s2293_s23, %s3031_s9  }
  0x41   : > { %s2535_s24 = scalar_select %p70_p9, %s2305_s26, %s72_s8  }
  0x42   : > { %3032 = sst [smem:[#allocation24_spill]] %s2532_s11  ;;  %p184_p11 = scmp.eq.s32.totalorder %s183_s29, 0 }
  0x43   : > { %3033 = sst [smem:[#allocation25_spill]] %s2535_s24  ;;  %p196_p12 = scmp.ne.s32.totalorder %s2281_s20, %s2277_s19 }
  0x44   : > { %p197_p13 = scmp.eq.s32.totalorder %s2445_s7, 3  ;;  %p202_p8 = scmp.ne.s32.totalorder %s2277_s19, %s2273_s18 }
  0x45   : > { %s2543_s21 = scalar_select %p184_p11, %s2281_s20, %s186_s15  }
  0x46   : > { %p2545_p1 = por %p197_p13, %p196_p12  ;;  %s3036_s2 = sadd.s32 4294967294, %s2325_s6  }
  0x47   : > { %3034 = sst [smem:[#allocation26_spill]] %s2543_s21  ;;  %p203_p3 = scmp.eq.s32.totalorder %s3036_s2, 3 }
  0x48   : > { %s3035_s13 = scalar_select %p2545_p1, 1, 0 }
  0x49   : > { %s226_s12 = sand.u32 1, %s2305_s26   ;;  %s1793_s17 = sshll.u32 %s64_s10, 8 }
  0x4a   : > { %p2552_p4 = por %p203_p3, %p202_p8  ;;  %s1745_s8 = sshll.u32 %s226_s12, 4 }
  0x4b   : > { %s3038_s1 = sld [smem:[#allocation28_spill]]  ;;  %p3039_p0 = scmp.lt.s32.totalorder %s2325_s6, 4 }
  0x4c   : > { %s3037_s9 = scalar_select %p2552_p4, 1, 0 }
  0x4d   : > { %p2565_p9 = pnand %p3039_p0, %p2512_p2  ;;  %s230_s10 = scalar_lea.vmem [#allocation5], %s1745_s8 }
  0x4e   : > { %s241_s2 = sshll.u32 %s230_s10, 4  ;;  %s1794_s26 = sshll.u32 %s2321_s30, 8  ;;  %s2569_s2 = int_to_ptr.vmem [resolvable:$true] %s241_s2 }
  0x4f   : > { %s2572_s11 = scalar_lea.sflag [#allocation6], %s226_s12  ;;  %p2123_p11 = pneg %p2565_p9 }
  0x51   : > { %s2559_s24 = scalar_lea.hbm %s3038_s1, %s1793_s17  ;;  %s2126_s16 = scalar_lea.hbm %s3038_s1, 512 }
  0x52   : > { %s2121_s29 = scalar_lea.hbm %s2559_s24, 256  ;;  %p2127_p2 = scmp.lt.s32.totalorder %s2559_s24, %s3038_s1 }
  0x53   : > { %p2122_p8 = scmp.ne.s32.totalorder %s2559_s24, %s2121_s29  ;;  %p2128_p3 = scmp.lt.s32.totalorder %s2126_s16, %s2121_s29 }
  0x55   : > { %p2124_p12 = pnand %p2123_p11, %p2122_p8  ;;  %p2129_p0 = por %p2128_p3, %p2127_p2 }
  0x57   : > { %p2125_p13 = pneg %p2124_p12 }
  0x59   : > { %p2130_p4 = pnand %p2129_p0, %p2125_p13 }
  0x5b   : > { %2133 = shalt.err (!%p2130_p4)
}
  0x5c   : > { %s2134_s12 = scalar_lea.vmem %s2569_s2, 256  ;;  %s2330_s8 = smov [#allocation5]  }
  0x5d   : > { %p2135_p1 = scmp.ne.s32.totalorder %s2569_s2, %s2134_s12  ;;  %s2139_s10 = sshll.u32 %s2330_s8, 4  ;;  %s2140_s10 = int_to_ptr.vmem [resolvable:$false] %s2139_s10 }
  0x5e   : > { %s2141_s27 = scalar_lea.vmem %s2140_s10, 512  ;;  %p2142_p12 = scmp.lt.s32.totalorder %s2569_s2, %s2140_s10 }
  0x5f   : > { %p2137_p6 = pnand %p2135_p1, %p2123_p11  ;;  %p2143_p5 = scmp.lt.s32.totalorder %s2141_s27, %s2134_s12 }
  0x61   : > { %p2138_p8 = pneg %p2137_p6  ;;  %p2144_p10 = por %p2143_p5, %p2142_p12 }
  0x63   : > { %p2145_p7 = pnand %p2144_p10, %p2138_p8 }
  0x65   : > { %2148 = shalt.err (!%p2145_p7)
}
  0x66   : > { %s2331_s23 = smov 32   ;;  %s2332_s21 = smov 2  }
  0x67   : > { %1903 = dma.hbm_to_vmem [thread:$0]  (!%p2565_p9), %s2559_s24, 256, %s2569_s2, %s2572_s11, %s2331_s23, %s2331_s23, %s2332_s21  }
  0x68   : > { %s282_s16 = scalar_lea.hbm %s2986_s3, %s1794_s26  ;;  %s276_s12 = scalar_lea.vmem [#allocation10], %s2474_s5 }
  0x69   : > { %s283_s8 = sshll.u32 %s276_s12, 4  ;;  %p3041_p6 = scmp.ne.s32.totalorder %s3024_s14, 0  ;;  %s284_s8 = int_to_ptr.vmem [resolvable:$true] %s283_s8 }
  0x6a   : > { %s2162_s10 = scalar_lea.vmem %s284_s8, 256  ;;  %s2333_s27 = smov [#allocation10]  }
  0x6b   : > { %p2163_p4 = scmp.ne.s32.totalorder %s284_s8, %s2162_s10  ;;  %p3042_p7 = pneg %p3041_p6 }
  0x6c   : > { %s2167_s1 = sshll.u32 %s2333_s27, 4  ;;  %s2168_s1 = int_to_ptr.vmem [resolvable:$false] %s2167_s1 }
  0x6d   : > { %p2165_p10 = pnand %p2163_p4, %p3042_p7  ;;  %s2169_s20 = scalar_lea.vmem %s2168_s1, 512 }
  0x6e   : > { %p2170_p1 = scmp.lt.s32.totalorder %s284_s8, %s2168_s1  ;;  %p2171_p9 = scmp.lt.s32.totalorder %s2169_s20, %s2162_s10 }
  0x6f   : > { %p2166_p5 = pneg %p2165_p10 }
  0x70   : > { %p2172_p11 = por %p2171_p9, %p2170_p1 }
  0x72   : > { %p2173_p13 = pnand %p2172_p11, %p2166_p5 }
  0x74   : > { %2176 = shalt.err (!%p2173_p13)
}
  0x75   : > { %s3043_s5 = smov 8   ;;  %s3044_s26 = smov 128  }
  0x76   : > { %1909 = dma.hbm_to_vmem [thread:$0]  (!%p3041_p6), %s282_s16, 256, %s284_s8, %s2476_s0, %s3044_s26, %s3044_s26, %s3043_s5  }
  0x77   : > { %p3045_p2 = scmp.ne.s32.totalorder %s3026_s4, 0 }
  0x78   : > { %s303_s11 = sand.u32 (!%p3045_p2), 1, %s2301_s25   ;;  %p3046_p3 = scmp.ne.s32.totalorder (!%p3045_p2), %s3030_s28, 0 }
  0x79   : > { %301 = sbr.rel (%p3045_p2) target bundleno = 5726 (0x165e), region = 40  ;;  %s1754_s24 = sshll.u32 (!%p3045_p2), %s303_s11, 4 }
  0x7a   : > { %s304_s15 = scalar_lea.sflag (!%p3045_p2), [#allocation6], %s303_s11  ;;  %s2611_s1 = scalar_lea.vmem (!%p3045_p2), [#allocation5], %s1754_s24 }
  0x7e   : > { %2260 = dma.done.wait (%p3046_p3), %s304_s15, 256  }
  0x7f   : > { %2262 = vsyncadd (%p3046_p3), %s304_s15, 4294967040  ;;  %s3047_s20 = sld [smem:[#allocation21_spill]]  ;;  %s312_s14 = sand.u32 1, %s2445_s7  }
  0x80   : > { %s314_s0 = sand.u32 1, %s2289_s22   ;;  %s313_s4 = scalar_lea.sflag [#allocation9], %s312_s14 }
  0x81   : > { %s1891_s2 = smul.u32 24, %s314_s0 }
  0x83   : > { %s316_s23 = scalar_lea.vmem [#allocation8], %s1891_s2 }
  0x85   : > { %p3048_p0 = scmp.ne.s32.totalorder %s3047_s20, 0 }
  0x87   : > { %2264 = dma.done.wait (%p3048_p0), %s313_s4, 640  }
  0x88   : > { %2266 = vsyncadd (%p3048_p0), %s313_s4, 4294966656  ;;  %s3049_s21 = sld [smem:[#allocation19_spill]]  ;;  %s2623_s29 = sshll.u32 %s314_s0, 4 }
  0x89   : > { %s362_s28 = sand.u32 1, %s2277_s19   ;;  %s3050_s12 = sld [smem:[#allocation30_spill]] }
  0x8a   : > { %s1756_s17 = sshll.u32 %s362_s28, 4  ;;  %s325_s10 = scalar_lea.vmem [#allocation10], %s2623_s29 }
  0x8b   : > { %s2637_s27 = scalar_lea.vmem [#allocation11], %s1756_s17  ;;  %s3051_s5 = sld [smem:[#allocation18_spill]] }
  0x8e   : > { %p370_p8 = scmp.lt.s32.totalorder %s3049_s21, 1 }
  0x90   : > { %s3086_s21 = smov (!%p370_p8, %s3049_s21), 1 }
  0x91   : > { %s372_s8 = scalar_lea.vmem %s3050_s12, %s3086_s21  ;;  %p1757_p12 = scmp.ne.s32.totalorder %s3051_s5, 0 }
  0x93   : > { %381 = sbr.rel (%p1757_p12) target bundleno = 154 (0x9a), region = 56 }
  0x98   : > { %vm382_vm0 = vcmask 123904   ;;  %v2334_v0 = vmov 0.0  }
  0x99   : > { %383 = vst.msk [vmem:[#allocation2] sm:$0x3] %vm382_vm0, %v2334_v0  ;;  %384 = vst.msk [vmem:[#allocation3] sm:$0x3] %vm382_vm0, %v2334_v0 }
  0x9a PF: > { %v395_v1 = vld [vmem:[%s316_s23 + $0x10] sm:$0xff]  ;;  %v394_v2 = vld [vmem:[%s316_s23 + $0x8] sm:$0xff]  ;;  %v393_v3 = vld [vmem:[%s316_s23] sm:$0xff]  ;;  %v409_v4 = vlaneseq  ;;  %v2335_v8 = vmov 1983009808   ;;  %v2336_v19 = vmov 0.0  }
  0x9b   : > { %1824 = vmatprep.subr.mxu0 %v395_v1  ;;  %v385_v5 = vld [vmem:[%s2611_s1] sm:$0x3]  ;;  %v386_v6 = vld [vmem:[%s2611_s1 + $0x2] sm:$0x3]  ;;  %v387_v7 = vld [vmem:[%s2611_s1 + $0x4] sm:$0x3]  ;;  %v407_v9 = vunpack.c.l.s4 %v2335_v8  ;;  %1833 = vmatprep.subr.mxu1 %v2336_v19 }
  0x9c   : > { %1825 = vmatpush3.msra.mxu0 %v395_v1  ;;  %v388_v10 = vld [vmem:[%s2611_s1 + $0x6] sm:$0x3]  ;;  %v410_v11 = vshrl.u32 %v409_v4, 7  ;;  %v389_v12 = vld [vmem:[%s2611_s1 + $0x8] sm:$0x3]  ;;  %v404_v13 = vcombine.low %v385_v5, %v386_v6  ;;  %v2651_v22 = vld [vmem:[%s325_s10 + $0x8] sm:$0xff] }
  0x9d   : > { %1826 = vmatprep.subr.mxu0 %v394_v2  ;;  %v405_v14 = vcombine.low %v387_v7, %v388_v10  ;;  %v408_v15 = vunpack.c.0.s8 %v407_v9  ;;  %v390_v16 = vld [vmem:[%s2611_s1 + $0xa] sm:$0x3]  ;;  %v391_v17 = vld [vmem:[%s2611_s1 + $0xc] sm:$0x3]  ;;  %v392_v18 = vld [vmem:[%s2611_s1 + $0xe] sm:$0x3]  ;;  %1834 = vmatpush3.msra.mxu1 %v2651_v22 }
  0x9e   : > { %1827 = vmatpush3.msra.mxu0 %v394_v2  ;;  %v421_v20 = vcombine.low %v389_v12, %v390_v16  ;;  %v422_v21 = vcombine.low %v391_v17, %v392_v18  ;;  %v2655_v23 = vld [vmem:[%s325_s10] sm:$0xff]  ;;  %1835 = vmatprep.subr.mxu1 %v2336_v19  ;;  %vm600_vm1 = vcmask 130048   ;;  %vm438_vm2 = vcmask 195584   ;;  %s3052_s26 = sld [smem:[#allocation19_spill]]  ;;  %v1760_v35 = vld [vmem:[%s372_s8] ss:$0 sm:$0xff] }
  0x9f   : > { %1828 = vmatprep.subr.mxu0 %v393_v3  ;;  %v411_v24 = vsub.s32 %v408_v15, %v410_v11  ;;  %1836 = vmatpush3.msra.mxu1 %v2655_v23  ;;  %vm2337_vm3 = vmmov 0   ;;  %vm577_vm4 = vcmask 517120   ;;  %s3054_s14 = sld [smem:[#allocation18_spill]]  ;;  %v2338_v57 = vmov 0   ;;  %s2339_s2 = smov 96  }
  0xa0   : > { %1829 = vmatpush3.msra.mxu0 %v393_v3  ;;  %v593_v25 = vld [vmem:[#allocation2] sm:$0x3]  ;;  %1837 = vmatprep.mubr.msk.f32.mxu1 %vm2337_vm3, %v2336_v19  ;;  %v594_v59 = vld [vmem:[#allocation3] sm:$0x3]  ;;  %s2340_s4 = smov 16   ;;  %s3055_s16 = sld [smem:[#allocation27_spill]] }
  0xa1   : > { %v412_v26 = vrot.slane %v404_v13, %v411_v24  ;;  %v419_v27 = vrot.slane %v405_v14, %v411_v24  ;;  %v429_v28 = vrot.slane %v421_v20, %v411_v24  ;;  %v436_v29 = vrot.slane %v422_v21, %v411_v24  ;;  %1840 = vmatprep.subr.mxu1 %v2336_v19  ;;  %s3010_s12 = smov 32   ;;  %s2342_s8 = smov 80  }
  0xa2   : > { %1838 = vmatmul.mubr.msk.f32.vlgmr.msra.gmra.mxu1 %vm600_vm1, %v593_v25  ;;  %1847 = vmatprep.subr.mxu0 %v2336_v19  ;;  %vm717_vm6 = vcmask 123904   ;;  %p3058_p7 = scmp.ne.s32.totalorder %s3035_s13, 0 }
  0xa3   : > { %v420_v30 = vcombine.low %v412_v26, %v419_v27  ;;  %v437_v31 = vcombine.low %v429_v28, %v436_v29  ;;  %1841 = vmatpush3.msra.mxu1 %v2651_v22  ;;  %1844 = vmatprep.mubr.msk.f32.mxu1 %vm2337_vm3, %v2336_v19 }
  0xa4   : > { %1842 = vmatprep.subr.mxu1 %v2336_v19  ;;  %p589_p4 = scmp.eq.s32.totalorder %s3052_s26, 1  ;;  %2043 = vset.pattern.permute.xlu1 %v2338_v57 }
  0xa5   : > { %1830 = vmatprep.mubr.msk.f32.mxu0 %vm438_vm2, %v420_v30  ;;  %1843 = vmatpush3.msra.mxu1 %v2655_v23  ;;  %s590_s23 = ssub.s32 1, %s3054_s14 }
  0xa6   : > { %1831 = vmatmul.mubr.msk.f32.vlgmr.msra.gmra.mxu0 %vm438_vm2, %v437_v31  ;;  %1854 = vmatprep.subr.mxu1 %v2336_v19  ;;  %s2686_s1 = scalar_select %p589_p4, 7, 0  ;;  %v2711_v63 = vld [vmem:[%s3055_s16] sm:$0x3] }
  0xa7   : > { %1848 = vmatpush3.msra.mxu0 %v2651_v22  ;;  %1851 = vmatprep.mubr.msk.f32.mxu0 %vm2337_vm3, %v2336_v19  ;;  %s3088_s23 = smov (!%p589_p4, %s590_s23), %s3054_s14 }
  0xa8   : > { %1849 = vmatprep.subr.mxu0 %v2336_v19  ;;  %s1762_s20 = sshll.u32 %s2686_s1, 1  ;;  %2044 = vset.pattern.permute.xlu0 %v2338_v57  ;;  %s2704_s21 = sshll.u32 %s3088_s23, 3 }
  0xa9   : > { %1850 = vmatpush3.msra.mxu0 %v2655_v23  ;;  %s598_s0 = scalar_lea.vmem [#allocation4], %s1762_s20  ;;  %s596_s29 = sadd.s32 %s2704_s21, %s2686_s1 }
  0xaa   : > { %1861 = vmatprep.subr.mxu0 %v2336_v19  ;;  %v701_v0 = vstv %s596_s29  ;;  %s716_s10 = scalar_lea.vmem %s2637_s27, %s1762_s20 [#allocation11] }
  0xab   : > { %vm702_vm5 = vcmp.lt.s32.totalorder %v701_v0, %v2711_v63  ;;  %s2731_s5 = scalar_select %p589_p4, 6, 1 }
  0xac   : > { %v1764_v4 = vsel %vm702_vm5, 1.0, %v2336_v19  ;;  %s2757_s20 = scalar_select %p589_p4, 5, 2 }
  0xad   : > { %s1765_s11 = sshll.u32 %s2731_s5, 1  ;;  %s720_s15 = sadd.s32 %s2704_s21, %s2731_s5 }
  0xae   : > { %s722_s24 = scalar_lea.vmem [#allocation4], %s1765_s11  ;;  %v819_v20 = vstv %s720_s15  ;;  %s834_s1 = scalar_lea.vmem %s2637_s27, %s1765_s11 [#allocation11] }
  0xaf   : > { %vm820_vm7 = vcmp.lt.s32.totalorder %v819_v20, %v2711_v63  ;;  %s837_s29 = sadd.s32 %s2704_s21, %s2757_s20 }
  0xb0   : > { %s2783_s7 = scalar_select %p589_p4, 4, 3 }
  0xb2   : > { %s1771_s16 = sshll.u32 %s2783_s7, 1  ;;  %s954_s5 = sadd.s32 %s2704_s21, %s2783_s7 }
  0xb3   : > { %s1068_s11 = scalar_lea.vmem %s2637_s27, %s1771_s16 [#allocation11] }
 0x162   : > { %v670_v32 = vpop.f32.mrf.mxu1 }
 0x164   : > { %v1839_v33 = vpop.f32.mrf.mxu1 }
 0x166   : > { %v1832_v34 = vpop.f32.mrf.mxu0 }
 0x167   : > { %v537_v36 = vcombine.high %v1832_v34, %v1832_v34  ;;  %v544_v37 = vrot.slane %v1832_v34, %v411_v24 }
 0x168   : > { %v509_v38 = vpop.f32.mrf.mxu0 }
 0x169   : > { %v551_v39 = vrot.slane %v537_v36, %v411_v24  ;;  %v552_v40 = vcombine.high %v544_v37, %v544_v37  ;;  %v573_v41 = vadd.f32 %v1760_v35, %v544_v37  ;;  %v520_v42 = vcombine.high %v509_v38, %v509_v38 }
 0x16a   : > { %v527_v43 = vrot.slane %v509_v38, %v411_v24 }
 0x16b   : > { %v553_v44 = vcombine.high %v551_v39, %v551_v39  ;;  %v574_v45 = vadd.f32 %v1760_v35, %v552_v40  ;;  %v575_v46 = vadd.f32 %v1760_v35, %v551_v39  ;;  %582 = vst.msk [vmem:[#allocation4 + $0x8] sm:$0x3] %vm577_vm4, %v573_v41  ;;  %v534_v47 = vrot.slane %v520_v42, %v411_v24 }
 0x16c   : > { %v535_v48 = vcombine.high %v527_v43, %v527_v43  ;;  %v569_v49 = vadd.f32 %v1760_v35, %v527_v43  ;;  %v1767_v24 = vsel %vm820_vm7, 1.0, %v2336_v19 }
 0x16d   : > { %v576_v50 = vadd.f32 %v1760_v35, %v553_v44  ;;  %583 = vst.msk [vmem:[#allocation4 + $0xa] sm:$0x3] %vm577_vm4, %v574_v45  ;;  %584 = vst.msk [vmem:[#allocation4 + $0xc] sm:$0x3] %vm577_vm4, %v575_v46  ;;  %v536_v51 = vcombine.high %v534_v47, %v534_v47  ;;  %v571_v52 = vadd.f32 %v1760_v35, %v534_v47  ;;  %v936_v45 = vstv %s837_s29 }
 0x16e   : > { %v570_v53 = vadd.f32 %v1760_v35, %v535_v48  ;;  %578 = vst.msk [vmem:[#allocation4] sm:$0x3] %vm577_vm4, %v569_v49  ;;  %vm937_vm8 = vcmp.lt.s32.totalorder %v936_v45, %v2711_v63 }
 0x16f   : > { %585 = vst.msk [vmem:[#allocation4 + $0xe] sm:$0x3] %vm577_vm4, %v576_v50  ;;  %v572_v54 = vadd.f32 %v1760_v35, %v536_v51  ;;  %580 = vst.msk [vmem:[#allocation4 + $0x4] sm:$0x3] %vm577_vm4, %v571_v52  ;;  %v1770_v47 = vsel %vm937_vm8, 1.0, %v2336_v19 }
 0x170   : > { %579 = vst.msk [vmem:[#allocation4 + $0x2] sm:$0x3] %vm577_vm4, %v570_v53 }
 0x171   : > { %581 = vst.msk [vmem:[#allocation4 + $0x6] sm:$0x3] %vm577_vm4, %v572_v54 }
 0x178   : > { %v599_v55 = vld [vmem:[%s598_s0] sm:$0x3]  ;;  %s1768_s0 = sshll.u32 %s2757_s20, 1 }
 0x179   : > { %v674_v56 = vadd.f32 %v670_v32, %v599_v55  ;;  %v723_v15 = vld [vmem:[%s722_s24] sm:$0x3]  ;;  %s839_s23 = scalar_lea.vmem [#allocation4], %s1768_s0  ;;  %s951_s17 = scalar_lea.vmem %s2637_s27, %s1768_s0 [#allocation11] }
 0x17a   : > { %v840_v41 = vld [vmem:[%s839_s23] sm:$0x3]  ;;  %s2808_s24 = scalar_select %p589_p4, 3, 4 }
 0x17b   : > { %2045 = vtanh.f32 %v674_v56  ;;  %v675_v60 = vmul.f32 0.5, %v674_v56  ;;  %s2833_s23 = scalar_select %p589_p4, 2, 5 }
 0x17c   : > { %s1774_s15 = sshll.u32 %s2808_s24, 1  ;;  %s1071_s20 = sadd.s32 %s2704_s21, %s2808_s24 }
 0x17d   : > { %2047 = vtanh.f32 %v675_v60  ;;  %s1185_s0 = scalar_lea.vmem %s2637_s27, %s1774_s15 [#allocation11]  ;;  %s1777_s29 = sshll.u32 %s2833_s23, 1 }
 0x17e   : > { %s1188_s7 = sadd.s32 %s2704_s21, %s2833_s23 }
 0x188   : > { %v2046_v58 = vpop.eup %2045 }
 0x189   : > { %686 = vrot.lane.b32.xlu0 %v2046_v58, %s2339_s2 }
 0x18a   : > { %v2048_v61 = vpop.eup %2047 }
 0x18b   : > { %v677_v62 = vmul.f32 0.5, %v2048_v61 }
 0x18d   : > { %681 = vrot.lane.b32.xlu0 %v594_v59, %s2340_s4  ;;  %v678_v1 = vadd.f32 0.5, %v677_v62 }
 0x1fb   : > { %v687_v2 = vpop.permute.xlu0 %686 }
 0x1fc   : > { %v689_v3 = vmul.f32 %v687_v2, %v678_v1 }
 0x1fe   : > { %691 = vrot.lane.b32.xlu1 %v689_v3, %s2340_s4 }
 0x1ff   : > { %v682_v5 = vpop.permute.xlu0 %681 }
 0x200   : > { %v684_v6 = vmul.f32 %v682_v5, %v678_v1  ;;  %v1053_v5 = vstv %s954_s5 }
 0x201   : > { %vm1054_vm9 = vcmp.lt.s32.totalorder %v1053_v5, %v2711_v63 }
 0x202   : > { %707 = vperm.xlu1 %2043, %v1764_v4  }
 0x270   : > { %v692_v7 = vpop.permute.xlu1 %691 }
 0x271   : > { %v694_v8 = vadd.f32 %v692_v7, %v684_v6  ;;  %v1773_v7 = vsel %vm1054_vm9, 1.0, %v2336_v19 }
 0x273   : > { %2049 = vtanh.f32 %v694_v8 }
 0x27d   : > { %v708_v12 = vpop.permute.xlu1 %707 }
 0x27e   : > { %v711_v31 = vmul.f32 %v708_v12, %v694_v8 }
 0x280   : > { %v2050_v9 = vpop.eup %2049 }
 0x281   : > { %697 = vrot.lane.b32.xlu0 %v2050_v9, %s3010_s12 }
 0x2f3   : > { %v698_v10 = vpop.permute.xlu0 %697 }
 0x2f4   : > { %v700_v11 = vmul.f32 %v698_v10, %v678_v1 }
 0x2f6   : > { %v710_v13 = vmul.f32 %v708_v12, %v700_v11 }
 0x2f8   : > { %713 = vrot.lane.b32.xlu1 %v710_v13, %s2342_s8 }
 0x36a   : > { %v714_v14 = vpop.permute.xlu1 %713 }
 0x36b   : > { %718 = vst.msk [vmem:[%s716_s10] sm:$0x3] %vm717_vm6, %v714_v14  ;;  %1845 = vmatmul.mubr.msk.f32.vlgmr.msra.gmra.mxu1 %vm600_vm1, %v714_v14  ;;  %s956_s10 = scalar_lea.vmem [#allocation4], %s1771_s16  ;;  %s1302_s16 = scalar_lea.vmem %s2637_s27, %s1777_s29 [#allocation11] }
 0x36c   : > { %1855 = vmatpush3.msra.mxu1 %v2651_v22  ;;  %1858 = vmatprep.mubr.msk.f32.mxu1 %vm2337_vm3, %v2336_v19  ;;  %v957_v1 = vld [vmem:[%s956_s10] sm:$0x3]  ;;  %s2853_s10 = scalar_select %p589_p4, 1, 6 }
 0x36d   : > { %1856 = vmatprep.subr.mxu1 %v2336_v19 }
 0x36e   : > { %1857 = vmatpush3.msra.mxu1 %v2655_v23  ;;  %s1780_s5 = sshll.u32 %s2853_s10, 1  ;;  %s1305_s24 = sadd.s32 %s2704_s21, %s2853_s10 }
 0x36f   : > { %1868 = vmatprep.subr.mxu1 %v2336_v19 }
 0x42b   : > { %v792_v16 = vpop.f32.mrf.mxu1 }
 0x42c   : > { %v796_v17 = vadd.f32 %v792_v16, %v723_v15 }
 0x42d   : > { %v1846_v18 = vpop.f32.mrf.mxu1 }
 0x42e   : > { %2051 = vtanh.f32 %v796_v17  ;;  %v797_v25 = vmul.f32 0.5, %v796_v17 }
 0x430   : > { %2053 = vtanh.f32 %v797_v25 }
 0x43b   : > { %v2052_v21 = vpop.eup %2051 }
 0x43c   : > { %804 = vrot.lane.b32.xlu0 %v2052_v21, %s2339_s2 }
 0x43d   : > { %v2054_v26 = vpop.eup %2053 }
 0x43e   : > { %v799_v27 = vmul.f32 0.5, %v2054_v26 }
 0x440   : > { %825 = vperm.xlu0 %2044, %v1767_v24   ;;  %v800_v28 = vadd.f32 0.5, %v799_v27 }
 0x442   : > { %v802_v32 = vmul.f32 %v800_v28, %v711_v31  ;;  %v1170_v31 = vstv %s1071_s20 }
 0x443   : > { %vm1171_vm10 = vcmp.lt.s32.totalorder %v1170_v31, %v2711_v63 }
 0x4ae   : > { %v805_v29 = vpop.permute.xlu0 %804 }
 0x4af   : > { %v807_v30 = vmul.f32 %v805_v29, %v800_v28 }
 0x4b1   : > { %809 = vrot.lane.b32.xlu1 %v807_v30, %s2340_s4 }
 0x4bb   : > { %v826_v38 = vpop.permute.xlu0 %825 }
 0x523   : > { %v810_v33 = vpop.permute.xlu1 %809 }
 0x524   : > { %v812_v34 = vadd.f32 %v810_v33, %v802_v32  ;;  %v1776_v33 = vsel %vm1171_vm10, 1.0, %v2336_v19 }
 0x526   : > { %2055 = vtanh.f32 %v812_v34  ;;  %v829_v54 = vmul.f32 %v826_v38, %v812_v34 }
 0x533   : > { %v2056_v35 = vpop.eup %2055 }
 0x534   : > { %815 = vrot.lane.b32.xlu1 %v2056_v35, %s3010_s12 }
 0x5a6   : > { %v816_v36 = vpop.permute.xlu1 %815 }
 0x5a7   : > { %v818_v37 = vmul.f32 %v816_v36, %v800_v28 }
 0x5a9   : > { %v828_v39 = vmul.f32 %v826_v38, %v818_v37 }
 0x5ab   : > { %831 = vrot.lane.b32.xlu1 %v828_v39, %s2342_s8 }
 0x61d   : > { %v832_v40 = vpop.permute.xlu1 %831 }
 0x61e   : > { %835 = vst.msk [vmem:[%s834_s1] sm:$0x3] %vm717_vm6, %v832_v40  ;;  %1852 = vmatmul.mubr.msk.f32.vlgmr.msra.gmra.mxu0 %vm600_vm1, %v832_v40  ;;  %s1073_s1 = scalar_lea.vmem [#allocation4], %s1774_s15  ;;  %s1419_s15 = scalar_lea.vmem %s2637_s27, %s1780_s5 [#allocation11] }
 0x61f   : > { %1862 = vmatpush3.msra.mxu0 %v2651_v22  ;;  %1865 = vmatprep.mubr.msk.f32.mxu0 %vm2337_vm3, %v2336_v19  ;;  %v1074_v27 = vld [vmem:[%s1073_s1] sm:$0x3]  ;;  %s2873_s1 = scalar_select %p589_p4, 0, 7 }
 0x620   : > { %1863 = vmatprep.subr.mxu0 %v2336_v19 }
 0x621   : > { %1864 = vmatpush3.msra.mxu0 %v2655_v23  ;;  %s1783_s20 = sshll.u32 %s2873_s1, 1  ;;  %s1422_s23 = sadd.s32 %s2704_s21, %s2873_s1 }
 0x622   : > { %1875 = vmatprep.subr.mxu0 %v2336_v19 }
 0x6de   : > { %v909_v42 = vpop.f32.mrf.mxu0 }
 0x6df   : > { %v913_v43 = vadd.f32 %v909_v42, %v840_v41 }
 0x6e0   : > { %v1853_v44 = vpop.f32.mrf.mxu0 }
 0x6e1   : > { %2057 = vtanh.f32 %v913_v43  ;;  %v914_v48 = vmul.f32 0.5, %v913_v43 }
 0x6e3   : > { %2059 = vtanh.f32 %v914_v48 }
 0x6ee   : > { %v2058_v46 = vpop.eup %2057 }
 0x6ef   : > { %921 = vrot.lane.b32.xlu0 %v2058_v46, %s2339_s2 }
 0x6f0   : > { %v2060_v49 = vpop.eup %2059 }
 0x6f1   : > { %v916_v50 = vmul.f32 0.5, %v2060_v49 }
 0x6f3   : > { %942 = vperm.xlu0 %2044, %v1770_v47   ;;  %v917_v51 = vadd.f32 0.5, %v916_v50 }
 0x6f5   : > { %v919_v55 = vmul.f32 %v917_v51, %v829_v54 }
 0x761   : > { %v922_v52 = vpop.permute.xlu0 %921 }
 0x762   : > { %v924_v53 = vmul.f32 %v922_v52, %v917_v51 }
 0x764   : > { %926 = vrot.lane.b32.xlu1 %v924_v53, %s2340_s4  ;;  %v1287_v53 = vstv %s1188_s7 }
 0x765   : > { %vm1288_vm11 = vcmp.lt.s32.totalorder %v1287_v53, %v2711_v63 }
 0x76e   : > { %v943_v61 = vpop.permute.xlu0 %942 }
 0x7d6   : > { %v927_v56 = vpop.permute.xlu1 %926 }
 0x7d7   : > { %v929_v57 = vadd.f32 %v927_v56, %v919_v55 }
 0x7d9   : > { %2061 = vtanh.f32 %v929_v57  ;;  %v946_v14 = vmul.f32 %v943_v61, %v929_v57 }
 0x7e6   : > { %v2062_v58 = vpop.eup %2061 }
 0x7e7   : > { %932 = vrot.lane.b32.xlu1 %v2062_v58, %s3010_s12 }
 0x859   : > { %v933_v59 = vpop.permute.xlu1 %932 }
 0x85a   : > { %v935_v60 = vmul.f32 %v933_v59, %v917_v51 }
 0x85c   : > { %v945_v62 = vmul.f32 %v943_v61, %v935_v60 }
 0x85e   : > { %948 = vrot.lane.b32.xlu0 %v945_v62, %s2342_s8 }
 0x8d0   : > { %v949_v0 = vpop.permute.xlu0 %948 }
 0x8d1   : > { %952 = vst.msk [vmem:[%s951_s17] sm:$0x3] %vm717_vm6, %v949_v0  ;;  %1859 = vmatmul.mubr.msk.f32.vlgmr.msra.gmra.mxu1 %vm600_vm1, %v949_v0  ;;  %s1190_s17 = scalar_lea.vmem [#allocation4], %s1777_s29 }
 0x8d2   : > { %1869 = vmatpush3.msra.mxu1 %v2651_v22  ;;  %1872 = vmatprep.mubr.msk.f32.mxu1 %vm2337_vm3, %v2336_v19  ;;  %v1191_v50 = vld [vmem:[%s1190_s17] sm:$0x3] }
 0x8d3   : > { %1870 = vmatprep.subr.mxu1 %v2336_v19 }
 0x8d4   : > { %1871 = vmatpush3.msra.mxu1 %v2655_v23 }
 0x8d5   : > { %1882 = vmatprep.subr.mxu1 %v2336_v19 }
 0x991   : > { %v1026_v2 = vpop.f32.mrf.mxu1 }
 0x992   : > { %v1030_v3 = vadd.f32 %v1026_v2, %v957_v1 }
 0x993   : > { %v1860_v4 = vpop.f32.mrf.mxu1 }
 0x994   : > { %2063 = vtanh.f32 %v1030_v3  ;;  %v1031_v8 = vmul.f32 0.5, %v1030_v3 }
 0x996   : > { %2065 = vtanh.f32 %v1031_v8 }
 0x9a1   : > { %v2064_v6 = vpop.eup %2063 }
 0x9a2   : > { %1038 = vrot.lane.b32.xlu1 %v2064_v6, %s2339_s2 }
 0x9a3   : > { %v2066_v9 = vpop.eup %2065 }
 0x9a4   : > { %v1033_v10 = vmul.f32 0.5, %v2066_v9 }
 0x9a6   : > { %1059 = vperm.xlu1 %2043, %v1773_v7   ;;  %v1034_v11 = vadd.f32 0.5, %v1033_v10 }
 0x9a8   : > { %v1036_v15 = vmul.f32 %v1034_v11, %v946_v14 }
 0xa14   : > { %v1039_v12 = vpop.permute.xlu1 %1038 }
 0xa15   : > { %v1041_v13 = vmul.f32 %v1039_v12, %v1034_v11  ;;  %v1404_v12 = vstv %s1305_s24  ;;  %s1536_s24 = scalar_lea.vmem %s2637_s27, %s1783_s20 [#allocation11] }
 0xa16   : > { %vm1405_vm12 = vcmp.lt.s32.totalorder %v1404_v12, %v2711_v63 }
 0xa17   : > { %1043 = vrot.lane.b32.xlu0 %v1041_v13, %s2340_s4  ;;  %v1782_v14 = vsel %vm1405_vm12, 1.0, %v2336_v19 }
 0xa21   : > { %v1060_v24 = vpop.permute.xlu1 %1059 }
 0xa89   : > { %v1044_v16 = vpop.permute.xlu0 %1043 }
 0xa8a   : > { %v1046_v17 = vadd.f32 %v1044_v16, %v1036_v15 }
 0xa8c   : > { %2067 = vtanh.f32 %v1046_v17  ;;  %v1063_v40 = vmul.f32 %v1060_v24, %v1046_v17 }
 0xa99   : > { %v2068_v18 = vpop.eup %2067 }
 0xa9a   : > { %1049 = vrot.lane.b32.xlu0 %v2068_v18, %s3010_s12 }
 0xb0c   : > { %v1050_v20 = vpop.permute.xlu0 %1049 }
 0xb0d   : > { %v1052_v21 = vmul.f32 %v1050_v20, %v1034_v11 }
 0xb0f   : > { %v1062_v25 = vmul.f32 %v1060_v24, %v1052_v21 }
 0xb11   : > { %1065 = vrot.lane.b32.xlu1 %v1062_v25, %s2342_s8 }
 0xb83   : > { %v1066_v26 = vpop.permute.xlu1 %1065 }
 0xb84   : > { %1069 = vst.msk [vmem:[%s1068_s11] sm:$0x3] %vm717_vm6, %v1066_v26  ;;  %1866 = vmatmul.mubr.msk.f32.vlgmr.msra.gmra.mxu0 %vm600_vm1, %v1066_v26  ;;  %s1307_s11 = scalar_lea.vmem [#allocation4], %s1780_s5 }
 0xb85   : > { %1876 = vmatpush3.msra.mxu0 %v2651_v22  ;;  %1879 = vmatprep.mubr.msk.f32.mxu0 %vm2337_vm3, %v2336_v19  ;;  %v1308_v8 = vld [vmem:[%s1307_s11] sm:$0x3]  ;;  %s1564_s11 = sshll.u32 %s2637_s27, 4  ;;  %s2344_s27 = smov [#allocation11]   ;;  %s2900_s11 = int_to_ptr.vmem [resolvable:$true] %s1564_s11 }
 0xb86   : > { %1877 = vmatprep.subr.mxu0 %v2336_v19 }
 0xb87   : > { %1878 = vmatpush3.msra.mxu0 %v2655_v23 }
 0xc44   : > { %v1143_v28 = vpop.f32.mrf.mxu0 }
 0xc45   : > { %v1147_v29 = vadd.f32 %v1143_v28, %v1074_v27 }
 0xc46   : > { %v1867_v30 = vpop.f32.mrf.mxu0 }
 0xc47   : > { %2069 = vtanh.f32 %v1147_v29  ;;  %v1148_v34 = vmul.f32 0.5, %v1147_v29 }
 0xc49   : > { %2071 = vtanh.f32 %v1148_v34 }
 0xc54   : > { %v2070_v32 = vpop.eup %2069 }
 0xc55   : > { %1155 = vrot.lane.b32.xlu0 %v2070_v32, %s2339_s2 }
 0xc56   : > { %v2072_v35 = vpop.eup %2071 }
 0xc57   : > { %v1150_v36 = vmul.f32 0.5, %v2072_v35 }
 0xc59   : > { %1176 = vperm.xlu0 %2044, %v1776_v33   ;;  %v1151_v37 = vadd.f32 0.5, %v1150_v36 }
 0xc5b   : > { %v1153_v41 = vmul.f32 %v1151_v37, %v1063_v40 }
 0xcc7   : > { %v1156_v38 = vpop.permute.xlu0 %1155 }
 0xcc8   : > { %v1158_v39 = vmul.f32 %v1156_v38, %v1151_v37  ;;  %v1521_v38 = vstv %s1422_s23  ;;  %s3056_s23 = sld [smem:[#allocation31_spill]] }
 0xcc9   : > { %vm1522_vm13 = vcmp.lt.s32.totalorder %v1521_v38, %v2711_v63 }
 0xcca   : > { %1160 = vrot.lane.b32.xlu1 %v1158_v39, %s2340_s4  ;;  %v1785_v40 = vsel %vm1522_vm13, 1.0, %v2336_v19 }
 0xcd4   : > { %v1177_v47 = vpop.permute.xlu0 %1176 }
 0xd3c   : > { %v1161_v42 = vpop.permute.xlu1 %1160 }
 0xd3d   : > { %v1163_v43 = vadd.f32 %v1161_v42, %v1153_v41 }
 0xd3f   : > { %2073 = vtanh.f32 %v1163_v43  ;;  %v1180_v61 = vmul.f32 %v1177_v47, %v1163_v43 }
 0xd4c   : > { %v2074_v44 = vpop.eup %2073 }
 0xd4d   : > { %1166 = vrot.lane.b32.xlu1 %v2074_v44, %s3010_s12 }
 0xdbf   : > { %v1167_v45 = vpop.permute.xlu1 %1166 }
 0xdc0   : > { %v1169_v46 = vmul.f32 %v1167_v45, %v1151_v37 }
 0xdc2   : > { %v1179_v48 = vmul.f32 %v1177_v47, %v1169_v46 }
 0xdc4   : > { %1182 = vrot.lane.b32.xlu0 %v1179_v48, %s2342_s8 }
 0xe36   : > { %v1183_v49 = vpop.permute.xlu0 %1182 }
 0xe37   : > { %1186 = vst.msk [vmem:[%s1185_s0] sm:$0x3] %vm717_vm6, %v1183_v49  ;;  %1873 = vmatmul.mubr.msk.f32.vlgmr.msra.gmra.mxu1 %vm600_vm1, %v1183_v49  ;;  %s1424_s0 = scalar_lea.vmem [#allocation4], %s1783_s20 }
 0xe38   : > { %1883 = vmatpush3.msra.mxu1 %v2651_v22  ;;  %1886 = vmatprep.mubr.msk.f32.mxu1 %vm2337_vm3, %v2336_v19  ;;  %v1425_v34 = vld [vmem:[%s1424_s0] sm:$0x3] }
 0xe39   : > { %1884 = vmatprep.subr.mxu1 %v2336_v19 }
 0xe3a   : > { %1885 = vmatpush3.msra.mxu1 %v2655_v23  ;;  %v1779_v23 = vsel %vm1288_vm11, 1.0, %v2336_v19 }
 0xef7   : > { %v1260_v51 = vpop.f32.mrf.mxu1 }
 0xef8   : > { %v1264_v52 = vadd.f32 %v1260_v51, %v1191_v50 }
 0xef9   : > { %v1874_v22 = vpop.f32.mrf.mxu1 }
 0xefa   : > { %2075 = vtanh.f32 %v1264_v52  ;;  %v1265_v55 = vmul.f32 0.5, %v1264_v52 }
 0xefc   : > { %2077 = vtanh.f32 %v1265_v55 }
 0xf07   : > { %v2076_v54 = vpop.eup %2075 }
 0xf08   : > { %1272 = vrot.lane.b32.xlu1 %v2076_v54, %s2339_s2 }
 0xf09   : > { %v2078_v56 = vpop.eup %2077 }
 0xf0a   : > { %v1267_v57 = vmul.f32 0.5, %v2078_v56 }
 0xf0c   : > { %1293 = vperm.xlu1 %2043, %v1779_v23   ;;  %v1268_v58 = vadd.f32 0.5, %v1267_v57 }
 0xf0e   : > { %v1270_v62 = vmul.f32 %v1268_v58, %v1180_v61 }
 0xf7a   : > { %v1273_v59 = vpop.permute.xlu1 %1272 }
 0xf7b   : > { %v1275_v60 = vmul.f32 %v1273_v59, %v1268_v58 }
 0xf7d   : > { %1277 = vrot.lane.b32.xlu0 %v1275_v60, %s2340_s4 }
 0xf87   : > { %v1294_v5 = vpop.permute.xlu1 %1293 }
 0xfef   : > { %v1278_v0 = vpop.permute.xlu0 %1277 }
 0xff0   : > { %v1280_v1 = vadd.f32 %v1278_v0, %v1270_v62 }
 0xff2   : > { %2079 = vtanh.f32 %v1280_v1  ;;  %v1297_v24 = vmul.f32 %v1294_v5, %v1280_v1 }
 0xfff   : > { %v2080_v2 = vpop.eup %2079 }
0x1000   : > { %1283 = vrot.lane.b32.xlu0 %v2080_v2, %s3010_s12 }
0x1072   : > { %v1284_v3 = vpop.permute.xlu0 %1283 }
0x1073   : > { %v1286_v4 = vmul.f32 %v1284_v3, %v1268_v58 }
0x1075   : > { %v1296_v6 = vmul.f32 %v1294_v5, %v1286_v4 }
0x1077   : > { %1299 = vrot.lane.b32.xlu1 %v1296_v6, %s2342_s8 }
0x10e9   : > { %v1300_v7 = vpop.permute.xlu1 %1299 }
0x10ea   : > { %1303 = vst.msk [vmem:[%s1302_s16] sm:$0x3] %vm717_vm6, %v1300_v7  ;;  %1880 = vmatmul.mubr.msk.f32.vlgmr.msra.gmra.mxu0 %vm600_vm1, %v1300_v7  ;;  %s1789_s16 = sshll.u32 %s3052_s26, 4 }
0x11aa   : > { %v1377_v9 = vpop.f32.mrf.mxu0 }
0x11ab   : > { %v1381_v10 = vadd.f32 %v1377_v9, %v1308_v8 }
0x11ac   : > { %v1881_v11 = vpop.f32.mrf.mxu0 }
0x11ad   : > { %2081 = vtanh.f32 %v1381_v10  ;;  %v1382_v15 = vmul.f32 0.5, %v1381_v10 }
0x11af   : > { %2083 = vtanh.f32 %v1382_v15 }
0x11ba   : > { %v2082_v13 = vpop.eup %2081 }
0x11bb   : > { %1389 = vrot.lane.b32.xlu0 %v2082_v13, %s2339_s2 }
0x11bc   : > { %v2084_v16 = vpop.eup %2083 }
0x11bd   : > { %v1384_v17 = vmul.f32 0.5, %v2084_v16 }
0x11bf   : > { %1410 = vperm.xlu0 %2044, %v1782_v14   ;;  %v1385_v18 = vadd.f32 0.5, %v1384_v17 }
0x11c1   : > { %v1387_v25 = vmul.f32 %v1385_v18, %v1297_v24 }
0x122d   : > { %v1390_v20 = vpop.permute.xlu0 %1389 }
0x122e   : > { %v1392_v21 = vmul.f32 %v1390_v20, %v1385_v18 }
0x1230   : > { %1394 = vrot.lane.b32.xlu1 %v1392_v21, %s2340_s4 }
0x123a   : > { %v1411_v31 = vpop.permute.xlu0 %1410 }
0x12a2   : > { %v1395_v26 = vpop.permute.xlu1 %1394 }
0x12a3   : > { %v1397_v27 = vadd.f32 %v1395_v26, %v1387_v25 }
0x12a5   : > { %2085 = vtanh.f32 %v1397_v27  ;;  %v1414_v47 = vmul.f32 %v1411_v31, %v1397_v27 }
0x12b2   : > { %v2086_v28 = vpop.eup %2085 }
0x12b3   : > { %1400 = vrot.lane.b32.xlu1 %v2086_v28, %s3010_s12 }
0x1325   : > { %v1401_v29 = vpop.permute.xlu1 %1400 }
0x1326   : > { %v1403_v30 = vmul.f32 %v1401_v29, %v1385_v18 }
0x1328   : > { %v1413_v32 = vmul.f32 %v1411_v31, %v1403_v30 }
0x132a   : > { %1416 = vrot.lane.b32.xlu0 %v1413_v32, %s2342_s8 }
0x139c   : > { %v1417_v33 = vpop.permute.xlu0 %1416 }
0x139d   : > { %1420 = vst.msk [vmem:[%s1419_s15] sm:$0x3] %vm717_vm6, %v1417_v33  ;;  %1887 = vmatmul.mubr.msk.f32.vlgmr.msra.gmra.mxu1 %vm600_vm1, %v1417_v33 }
0x145d   : > { %v1494_v35 = vpop.f32.mrf.mxu1 }
0x145e   : > { %v1498_v36 = vadd.f32 %v1494_v35, %v1425_v34 }
0x145f   : > { %v1888_v37 = vpop.f32.mrf.mxu1 }
0x1460   : > { %2087 = vtanh.f32 %v1498_v36  ;;  %v1499_v41 = vmul.f32 0.5, %v1498_v36 }
0x1462   : > { %2089 = vtanh.f32 %v1499_v41 }
0x146d   : > { %v2088_v39 = vpop.eup %2087 }
0x146e   : > { %1506 = vrot.lane.b32.xlu1 %v2088_v39, %s2339_s2  ;;  %s2343_s2 = smov 112  }
0x146f   : > { %v2090_v42 = vpop.eup %2089 }
0x1470   : > { %v1501_v43 = vmul.f32 0.5, %v2090_v42 }
0x1472   : > { %1527 = vperm.xlu1 %2043, %v1785_v40   ;;  %v1502_v44 = vadd.f32 0.5, %v1501_v43 }
0x1474   : > { %v1504_v48 = vmul.f32 %v1502_v44, %v1414_v47 }
0x14e0   : > { %v1507_v45 = vpop.permute.xlu1 %1506 }
0x14e1   : > { %v1509_v46 = vmul.f32 %v1507_v45, %v1502_v44 }
0x14e3   : > { %1511 = vrot.lane.b32.xlu0 %v1509_v46, %s2340_s4  ;;  %s1787_s4 = sshll.u32 %s3054_s14, 1 }
0x14e4   : > { %s1553_s21 = ssub.s32 1, %s1787_s4 }
0x14e5   : > { %s1554_s29 = smul.u32 %s3052_s26, %s1553_s21  ;;  %s2906_s26 = scalar_lea.sflag [#allocation7], %s362_s28 }
0x14e7   : > { %s1555_s17 = sadd.s32 %s3054_s14, %s1554_s29  ;;  %s2177_s14 = scalar_lea.vmem %s2900_s11, 256 }
0x14e8   : > { %s1788_s7 = sshll.u32 %s1555_s17, 3  ;;  %p2178_p6 = scmp.ne.s32.totalorder %s2900_s11, %s2177_s14 }
0x14e9   : > { %s1561_s10 = sadd.s32 %s1789_s16, %s1788_s7 }
0x14ea   : > { %s1790_s5 = sshll.u32 %s1561_s10, 5  ;;  %p2179_p10 = pnand %p2178_p6, %p3058_p7 }
0x14ec   : > { %p2180_p5 = pneg %p2179_p10 }
0x14ed   : > { %v1528_v19 = vpop.permute.xlu1 %1527 }
0x1555   : > { %v1512_v49 = vpop.permute.xlu0 %1511 }
0x1556   : > { %v1514_v63 = vadd.f32 %v1512_v49, %v1504_v48 }
0x1558   : > { %2091 = vtanh.f32 %v1514_v63  ;;  %v1531_v51 = vmul.f32 %v1528_v19, %v1514_v63 }
0x1565   : > { %v2092_v50 = vpop.eup %2091 }
0x1566   : > { %1517 = vrot.lane.b32.xlu0 %v2092_v50, %s3010_s12  ;;  %s2898_s12 = scalar_lea.hbm %s3056_s23, %s1790_s5 }
0x156a   : > { %1540 = vrot.lane.b32.xlu0 %v1531_v51, %s2343_s2  ;;  %s3057_s2 = smov %s3056_s23 }
0x15d8   : > { %v1518_v52 = vpop.permute.xlu0 %1517 }
0x15d9   : > { %v1520_v22 = vmul.f32 %v1518_v52, %v1502_v44 }
0x15db   : > { %v1530_v53 = vmul.f32 %v1528_v19, %v1520_v22 }
0x15dc   : > { %v1541_v54 = vpop.permute.xlu0 %1540 }
0x15dd   : > { %1543 = vst.msk [vmem:[#allocation3] sm:$0x3] %vm717_vm6, %v1541_v54  ;;  %1533 = vrot.lane.b32.xlu1 %v1530_v53, %s2342_s8  ;;  %s2181_s8 = sshll.u32 %s2344_s27, 4  ;;  %s2182_s8 = int_to_ptr.vmem [resolvable:$false] %s2181_s8 }
0x15de   : > { %s2183_s1 = scalar_lea.vmem %s2182_s8, 512  ;;  %p2184_p1 = scmp.lt.s32.totalorder %s2900_s11, %s2182_s8 }
0x15df   : > { %p2185_p9 = scmp.lt.s32.totalorder %s2183_s1, %s2177_s14 }
0x15e1   : > { %p2186_p11 = por %p2185_p9, %p2184_p1 }
0x15e3   : > { %p2187_p13 = pnand %p2186_p11, %p2180_p5 }
0x164f   : > { %v1534_v23 = vpop.permute.xlu1 %1533 }
0x1650   : > { %1537 = vst.msk [vmem:[%s1536_s24] sm:$0x3] %vm717_vm6, %v1534_v23  ;;  %1538 = vst.msk [vmem:[#allocation2] sm:$0x3] %vm717_vm6, %v1534_v23 }
0x1651   : > { %2190 = shalt.err (!%p2187_p13)
}
0x1652   : > { %s2191_s28 = scalar_lea.hbm %s2898_s12, 256  ;;  %s2195_s21 = scalar_lea.hbm %s3057_s2, 1024 }
0x1653   : > { %p2192_p2 = scmp.ne.s32.totalorder %s2898_s12, %s2191_s28  ;;  %p2196_p8 = scmp.lt.s32.totalorder %s2898_s12, %s3057_s2 }
0x1654   : > { %p2197_p12 = scmp.lt.s32.totalorder %s2195_s21, %s2191_s28 }
0x1655   : > { %p2193_p3 = pnand %p2192_p2, %p3058_p7 }
0x1656   : > { %p2198_p4 = por %p2197_p12, %p2196_p8 }
0x1657   : > { %p2194_p0 = pneg %p2193_p3 }
0x1659   : > { %p2199_p6 = pnand %p2198_p4, %p2194_p0 }
0x165b   : > { %2202 = shalt.err (!%p2199_p6)
}
0x165c   : > { %s2345_s7 = smov 2   ;;  %s3059_s16 = smov 32  }
0x165d   : > { %1898 = dma.vmem_to_hbm [thread:$0]  (%p3058_p7), %s2900_s11, 256, %s2898_s12, %s2906_s26, %s3059_s16, %s3059_s16, %s2345_s7  }
0x165e PF: > { %p1915_p10 = scmp.ge.s32.totalorder %s2325_s6, 2  ;;  %s1579_s10 = sand.u32 1, %s2273_s18  }
0x165f   : > { %p3060_p5 = scmp.ne.s32.totalorder %s3037_s9, 0  ;;  %s1580_s5 = scalar_lea.sflag [#allocation7], %s1579_s10 }
0x1661   : > { %p1911_p1 = pnand %p1915_p10, %p3060_p5 }
0x1663   : > { %p1912_p9 = pneg %p1911_p1 }
0x1665   : > { %2268 = dma.done.wait (%p1912_p9), %s1580_s5, 256  }
0x1666   : > { %2270 = vsyncadd (%p1912_p9), %s1580_s5, 4294967040  ;;  %s24_s6 = sadd.s32 1, %s2325_s6   ;;  %s3062_s12 = sld [smem:[#allocation15_spill]] }
0x1667   : > { %p2936_p11 = scmp.ge.s32.totalorder %s24_s6, 6   ;;  %s3063_s20 = sld [smem:[#allocation26_spill]] }
0x1668   : > { %s3064_s11 = sld [smem:[#allocation16_spill]]  ;;  %s3071_s18 = smov %s2277_s19 }
0x1669   : > { %s3065_s23 = sld [smem:[#allocation24_spill]]  ;;  %s3073_s21 = smov %s2289_s22 }
0x166a   : > { %s3066_s15 = sld [smem:[#allocation17_spill]]  ;;  %s3075_s24 = smov %s2301_s25 }
0x166b   : > { %s3067_s26 = sld [smem:[#allocation25_spill]]  ;;  %s3077_s28 = smov %s2321_s30 }
0x166c   : > { %s3068_s27 = sld [smem:[#allocation20_spill]]  ;;  %s3072_s19 = smov %s3062_s12 }
0x166d   : > { %s3069_s29 = sld [smem:[#allocation22_spill]] }
0x166e   : > { %s3070_s9 = sld [smem:[#allocation23_spill]]  ;;  %s3074_s22 = smov %s3064_s11 }
0x1670   : > { %s3076_s25 = smov %s3066_s15  ;;  %23 = sbr.rel (!%p2936_p11) target bundleno = 18 (0x12), region = 132 }
0x1674   : > { %s3078_s30 = smov %s3070_s9 }
0x1675   :  { %1585 = vsyncpa [#allocation6], 1 }
0x1676   :  { %1587 = vsyncpa [#allocation6 + $0x1], 1 }
0x1677   :  { %1588 = vsyncpa [#allocation9], 1 }
0x1678   :  { %1590 = vsyncpa [#allocation9 + $0x1], 1 }
0x1679   :  { %1591 = vsyncpa [#allocation7], 1 }
0x167a   :  { %1593 = vsyncpa [#allocation7 + $0x1], 1 }

</bundles_post_ra>
